<compile_context>
chip_gen: v7x
topology: tpu7x:2x2x1
jax: 0.10.0
libtpu: 0.0.40
codegen_flags: <defaults>
</compile_context>

<pallas_src>
import functools
import math

import jax
import jax.numpy as jnp
from jax import lax
from jax.experimental import pallas as pl
from jax.experimental.pallas import tpu as pltpu

_LOG_2PI = math.log(2.0 * math.pi)


def _softplus(x):
    # numerically stable softplus, matches torch.nn.Softplus default
    return jnp.maximum(x, 0.0) + jnp.log1p(jnp.exp(-jnp.abs(x)))


def _round_up(n, m):
    return ((n + m - 1) // m) * m


def _pick_tb(batch):
    """Batch tile: one grid step on single-TC chips (v5e/v6e); two 128-aligned
    'parallel' steps on dual-TC v7x; capped so huge batches still fit VMEM."""
    try:
        kind = jax.devices()[0].device_kind.lower()
    except Exception:  # pragma: no cover - device query should not fail
        kind = ""
    dual_tc = "v7" in kind
    b8 = _round_up(batch, 8)
    if dual_tc and b8 >= 256:
        tb = _round_up(-(-b8 // 2), 128)   # half the batch, 128-lane aligned
    else:
        tb = b8
    return min(tb, 1024)


def _vmf_kernel(x_ref, w1_ref, b1_ref, w2_ref, b2_ref, wh_ref, bh_ref,
                eps_ref, z_ref, logq_ref, *, n_samples, latent_size):
    S, L = n_samples, latent_size
    SL = S * L

    # --- inference MLP (MXU matmuls + ReLU), f32 accumulation ----------------
    x = x_ref[...].astype(jnp.float32)
    h1 = jnp.maximum(
        jnp.dot(x, w1_ref[...], preferred_element_type=jnp.float32)
        + b1_ref[...].astype(jnp.float32), 0.0)
    h2 = jnp.maximum(
        jnp.dot(h1, w2_ref[...], preferred_element_type=jnp.float32)
        + b2_ref[...].astype(jnp.float32), 0.0)

    # fused head: columns are [loc x S | scale_arg x S], already tiled to the
    # flattened (S*L) sample-lane layout of eps -> only static lane slices.
    head = (jnp.dot(h2, wh_ref[...], preferred_element_type=jnp.float32)
            + bh_ref[...].astype(jnp.float32))                    # (tb, 2*S*L)
    loc_t = head[:, :SL]                                          # (tb, S*L)
    scale_t = _softplus(head[:, SL:])                             # (tb, S*L)

    # --- reparameterized sample on the flat (tb, S*L) slab -------------------
    eps = eps_ref[...].astype(jnp.float32)                        # (tb, S*L)
    z_ref[...] = (loc_t + scale_t * eps).astype(z_ref.dtype)

    # --- log q(z_0) under N(loc, scale); flow is identity ---------------------
    #   log q[s,b] = -0.5*L*log(2pi) - sum_l log(scale[b,l]) - 0.5*sum_l eps[b,s,l]^2
    # Emitted lane-dense as (S, tb): the per-sample lane-group sum is a tiny
    # MXU dot against a 0/1 selection matrix, which puts batch on the lane
    # axis directly (no vector transpose, no masked narrow stores).
    g = jnp.log(scale_t) + 0.5 * (eps * eps)                      # (tb, S*L)
    lane = lax.broadcasted_iota(jnp.int32, (S, SL), 1)
    lo = lax.broadcasted_iota(jnp.int32, (S, SL), 0) * L
    sel = ((lane >= lo) & (lane < lo + L)).astype(jnp.float32)    # (S, S*L)
    ssum = lax.dot_general(sel, g, (((1,), (1,)), ((), ())),
                           preferred_element_type=jnp.float32)    # (S, tb)
    logq_ref[...] = ((-0.5 * L * _LOG_2PI) - ssum).astype(logq_ref.dtype)


def prepare_params(params, *, latent_size, n_samples, dtype=jnp.float32):
    """One-time param preparation (call OUTSIDE jit):
      * zero-pad w1 rows so the data dim is a lane-dense multiple of 128,
      * drop the dead `h` context third of the last Linear (identity flow),
      * fuse the live loc/scale columns into ONE head matrix and tile them
        n_samples times so the head matmul directly produces the flattened
        (S*L) per-sample lane layout used by eps / z.
    Pass dtype=jnp.bfloat16 on v6e/v7x to halve weight DMA (accumulation stays
    f32 via preferred_element_type)."""
    L, S = latent_size, n_samples
    w1, b1 = params["w1"], params["b1"]
    w2, b2 = params["w2"], params["b2"]
    w3, b3 = params["w3"], params["b3"]
    D = w1.shape[0]
    d_pad = _round_up(D, 128)
    w1p = jnp.pad(w1, ((0, d_pad - D), (0, 0)))
    w_head = jnp.concatenate([w3[:, :L]] * S + [w3[:, L:2 * L]] * S, axis=1)
    b_head = jnp.concatenate([b3[:, :L]] * S + [b3[:, L:2 * L]] * S, axis=1)
    return dict(w1=w1p.astype(dtype), b1=b1.astype(dtype),
                w2=w2.astype(dtype), b2=b2.astype(dtype),
                w_head=w_head.astype(dtype), b_head=b_head.astype(dtype))


def variational_mean_field(x, eps, prep, *, latent_size, tb=None):
    """Pallas forward.  Returns (z_T, log_q_z) with shapes (B,S,L), (B,S,1)."""
    B, D = x.shape
    Be, S, L = eps.shape
    assert Be == B and L == latent_size
    w1, b1 = prep["w1"], prep["b1"]
    w2, b2 = prep["w2"], prep["b2"]
    wh, bh = prep["w_head"], prep["b_head"]
    d_pad, H = w1.shape
    assert wh.shape == (H, 2 * S * L), "prepare_params n_samples mismatch"

    if tb is None:
        tb = _pick_tb(B)
    b_pad = _round_up(B, tb)
    grid = (b_pad // tb,)

    if d_pad != D or b_pad != B:
        x = jnp.pad(x, ((0, b_pad - B), (0, d_pad - D)))
    if b_pad != B:
        eps = jnp.pad(eps, ((0, b_pad - B), (0, 0), (0, 0)))
    eps2d = eps.reshape(b_pad, S * L)           # flat per-sample lane layout

    kernel = functools.partial(_vmf_kernel, n_samples=S, latent_size=L)
    z2d, logq_t = pl.pallas_call(
        kernel,
        out_shape=(jax.ShapeDtypeStruct((b_pad, S * L), jnp.float32),
                   jax.ShapeDtypeStruct((S, b_pad), jnp.float32)),
        grid=grid,
        in_specs=[
            pl.BlockSpec((tb, d_pad), lambda i: (i, 0)),        # x (batch-tiled, lane-dense)
            pl.BlockSpec((d_pad, H), lambda i: (0, 0)),         # w1 (grid-invariant)
            pl.BlockSpec((1, H), lambda i: (0, 0)),             # b1
            pl.BlockSpec((H, H), lambda i: (0, 0)),             # w2
            pl.BlockSpec((1, H), lambda i: (0, 0)),             # b2
            pl.BlockSpec((H, 2 * S * L), lambda i: (0, 0)),     # fused/tiled head W
            pl.BlockSpec((1, 2 * S * L), lambda i: (0, 0)),     # fused/tiled head b
            pl.BlockSpec((tb, S * L), lambda i: (i, 0)),        # eps (flat, batch-tiled)
        ],
        out_specs=(pl.BlockSpec((tb, S * L), lambda i: (i, 0)),   # z (flat)
                   pl.BlockSpec((S, tb), lambda i: (0, i))),      # log_q (lane-dense)
        compiler_params=pltpu.CompilerParams(
            dimension_semantics=("parallel",)),
    )(x, w1, b1, w2, b2, wh, bh, eps2d)

    z = z2d[:B].reshape(B, S, L)
    log_q_z = jnp.transpose(logq_t)[:B, :, None]   # (B, S, 1) keepdim sum
    return z, log_q_z


def _init_linear(key, fan_in, fan_out):
    # PyTorch nn.Linear default: U(-1/sqrt(fan_in), 1/sqrt(fan_in))
    kw, kb = jax.random.split(key)
    bound = 1.0 / jnp.sqrt(fan_in)
    w = jax.random.uniform(kw, (fan_in, fan_out), jnp.float32, -bound, bound)
    b = jax.random.uniform(kb, (1, fan_out), jnp.float32, -bound, bound)
    return w, b


def _reference(x, eps, params, latent_size):
    """Pure-JAX reference (original, un-simplified formula, full w3)."""
    P = jax.lax.Precision.HIGHEST
    h1 = jnp.maximum(jnp.dot(x, params["w1"], precision=P) + params["b1"], 0.0)
    h2 = jnp.maximum(jnp.dot(h1, params["w2"], precision=P) + params["b2"], 0.0)
    out = jnp.dot(h2, params["w3"], precision=P) + params["b3"]
    L = latent_size
    loc, scale_arg = out[:, :L], out[:, L:2 * L]
    scale = _softplus(scale_arg)
    loc_b, scale_b = loc[:, None, :], scale[:, None, :]
    z0 = loc_b + scale_b * eps
    var = scale_b ** 2
    log_q = -0.5 * jnp.log(2.0 * jnp.pi * var) - (z0 - loc_b) ** 2 / (2.0 * var)
    return z0, jnp.sum(log_q, axis=-1, keepdims=True)


if __name__ == "__main__":
    # shapes consistent with the module (hidden_size = 2 * latent_size)
    latent_size = 16
    data_size = 64
    hidden_size = 2 * latent_size
    B, n_samples = 256, 2

    key = jax.random.PRNGKey(0)
    kx, keps, k1, k2, k3 = jax.random.split(key, 5)

    x = jax.random.normal(kx, (B, data_size), jnp.float32)
    eps = jax.random.normal(keps, (B, n_samples, latent_size), jnp.float32)

    w1, b1 = _init_linear(k1, data_size, hidden_size)
    w2, b2 = _init_linear(k2, hidden_size, hidden_size)
    w3, b3 = _init_linear(k3, hidden_size, 3 * latent_size)
    params = dict(w1=w1, b1=b1, w2=w2, b2=b2, w3=w3, b3=b3)

    # f32 params in the demo so the correctness check stays tight; use
    # dtype=jnp.bfloat16 on v6e/v7x to halve weight DMA.
    prep = prepare_params(params, latent_size=latent_size, n_samples=n_samples)

    fn = jax.jit(functools.partial(variational_mean_field,
                                   latent_size=latent_size))
    z_T, log_q_z = fn(x, eps, prep)
    jax.block_until_ready((z_T, log_q_z))

    z_ref, logq_ref = _reference(x, eps, params, latent_size)
    assert z_T.shape == (B, n_samples, latent_size)
    assert log_q_z.shape == (B, n_samples, 1)
    # Tolerances leave headroom for the TPU MXU's reduced-precision f32 matmul
    # passes (reference runs at Precision.HIGHEST); semantic errors would be
    # orders of magnitude larger.
    assert jnp.allclose(z_T, z_ref, atol=5e-3, rtol=1e-3), \
        float(jnp.max(jnp.abs(z_T - z_ref)))
    assert jnp.allclose(log_q_z, logq_ref, atol=5e-2, rtol=1e-3), \
        float(jnp.max(jnp.abs(log_q_z - logq_ref)))
    print("KERNEL_OK")
</pallas_src>

<mosaic_0001>
module attributes {stable_mosaic.version = 11 : i64} {
  func.func @_vmf_kernel(%arg0: i32, %arg1: memref<256x128xf32, #tpu.memory_space<vmem>>, %arg2: memref<128x32xf32, #tpu.memory_space<vmem>>, %arg3: memref<1x32xf32, #tpu.memory_space<vmem>>, %arg4: memref<32x32xf32, #tpu.memory_space<vmem>>, %arg5: memref<1x32xf32, #tpu.memory_space<vmem>>, %arg6: memref<32x64xf32, #tpu.memory_space<vmem>>, %arg7: memref<1x64xf32, #tpu.memory_space<vmem>>, %arg8: memref<256x32xf32, #tpu.memory_space<vmem>>, %arg9: memref<256x32xf32, #tpu.memory_space<vmem>>, %arg10: memref<2x256xf32, #tpu.memory_space<vmem>>) attributes {dimension_semantics = [#tpu.dimension_semantics<parallel>], iteration_bounds = array<i64: 1>, scalar_prefetch = 0 : i64, scratch_operands = 0 : i64, tpu.core_type = #tpu.core_type<tc>, window_params = [{transform_indices = @transform_0, window_bounds = array<i64: 256, 128>}, {pipeline_mode = #tpu.pipeline_mode<synchronous>, transform_indices = @transform_1, window_bounds = array<i64: 128, 32>}, {pipeline_mode = #tpu.pipeline_mode<synchronous>, transform_indices = @transform_2, window_bounds = array<i64: 1, 32>}, {pipeline_mode = #tpu.pipeline_mode<synchronous>, transform_indices = @transform_3, window_bounds = array<i64: 32, 32>}, {pipeline_mode = #tpu.pipeline_mode<synchronous>, transform_indices = @transform_4, window_bounds = array<i64: 1, 32>}, {pipeline_mode = #tpu.pipeline_mode<synchronous>, transform_indices = @transform_5, window_bounds = array<i64: 32, 64>}, {pipeline_mode = #tpu.pipeline_mode<synchronous>, transform_indices = @transform_6, window_bounds = array<i64: 1, 64>}, {transform_indices = @transform_7, window_bounds = array<i64: 256, 32>}, {transform_indices = @transform_8, window_bounds = array<i64: 256, 32>}, {transform_indices = @transform_9, window_bounds = array<i64: 2, 256>}]} {
    %c0 = arith.constant 0 : index
    %c0_0 = arith.constant 0 : index
    %0 = vector.load %arg1[%c0, %c0_0] : memref<256x128xf32, #tpu.memory_space<vmem>>, vector<256x128xf32>
    %c0_1 = arith.constant 0 : index
    %c0_2 = arith.constant 0 : index
    %1 = vector.load %arg2[%c0_1, %c0_2] : memref<128x32xf32, #tpu.memory_space<vmem>>, vector<128x32xf32>
    %cst = arith.constant dense<0.000000e+00> : vector<256x32xf32>
    %2 = tpu.matmul %0, %1, %cst {dimension_numbers = #tpu.dot_dimension_numbers<[1], [0], [0], [1], [0, 0, 1, 1], [], []>} : vector<256x128xf32>, vector<128x32xf32>, vector<256x32xf32> -> vector<256x32xf32>
    %c0_3 = arith.constant 0 : index
    %c0_4 = arith.constant 0 : index
    %3 = vector.load %arg3[%c0_3, %c0_4] : memref<1x32xf32, #tpu.memory_space<vmem>>, vector<1x32xf32>
    %4 = vector.broadcast %3 : vector<1x32xf32> to vector<256x32xf32>
    %5 = arith.addf %2, %4 : vector<256x32xf32>
    %cst_5 = arith.constant 0.000000e+00 : f32
    %6 = vector.broadcast %cst_5 : f32 to vector<256x32xf32>
    %7 = arith.maximumf %5, %6 : vector<256x32xf32>
    %c0_6 = arith.constant 0 : index
    %c0_7 = arith.constant 0 : index
    %8 = vector.load %arg4[%c0_6, %c0_7] : memref<32x32xf32, #tpu.memory_space<vmem>>, vector<32x32xf32>
    %cst_8 = arith.constant dense<0.000000e+00> : vector<256x32xf32>
    %9 = tpu.matmul %7, %8, %cst_8 {dimension_numbers = #tpu.dot_dimension_numbers<[1], [0], [0], [1], [0, 0, 1, 1], [], []>} : vector<256x32xf32>, vector<32x32xf32>, vector<256x32xf32> -> vector<256x32xf32>
    %c0_9 = arith.constant 0 : index
    %c0_10 = arith.constant 0 : index
    %10 = vector.load %arg5[%c0_9, %c0_10] : memref<1x32xf32, #tpu.memory_space<vmem>>, vector<1x32xf32>
    %11 = vector.broadcast %10 : vector<1x32xf32> to vector<256x32xf32>
    %12 = arith.addf %9, %11 : vector<256x32xf32>
    %cst_11 = arith.constant 0.000000e+00 : f32
    %13 = vector.broadcast %cst_11 : f32 to vector<256x32xf32>
    %14 = arith.maximumf %12, %13 : vector<256x32xf32>
    %c0_12 = arith.constant 0 : index
    %c0_13 = arith.constant 0 : index
    %15 = vector.load %arg6[%c0_12, %c0_13] : memref<32x64xf32, #tpu.memory_space<vmem>>, vector<32x64xf32>
    %cst_14 = arith.constant dense<0.000000e+00> : vector<256x64xf32>
    %16 = tpu.matmul %14, %15, %cst_14 {dimension_numbers = #tpu.dot_dimension_numbers<[1], [0], [0], [1], [0, 0, 1, 1], [], []>} : vector<256x32xf32>, vector<32x64xf32>, vector<256x64xf32> -> vector<256x64xf32>
    %c0_15 = arith.constant 0 : index
    %c0_16 = arith.constant 0 : index
    %17 = vector.load %arg7[%c0_15, %c0_16] : memref<1x64xf32, #tpu.memory_space<vmem>>, vector<1x64xf32>
    %18 = vector.broadcast %17 : vector<1x64xf32> to vector<256x64xf32>
    %19 = arith.addf %16, %18 : vector<256x64xf32>
    %20 = vector.extract_strided_slice %19 {offsets = [0, 0], sizes = [256, 32], strides = [1, 1]} : vector<256x64xf32> to vector<256x32xf32>
    %21 = vector.extract_strided_slice %19 {offsets = [0, 32], sizes = [256, 32], strides = [1, 1]} : vector<256x64xf32> to vector<256x32xf32>
    %cst_17 = arith.constant 0.000000e+00 : f32
    %22 = vector.broadcast %cst_17 : f32 to vector<256x32xf32>
    %23 = arith.maximumf %21, %22 : vector<256x32xf32>
    %24 = math.absf %21 : vector<256x32xf32>
    %cst_18 = arith.constant 0.000000e+00 : f32
    %25 = vector.broadcast %cst_18 : f32 to vector<256x32xf32>
    %26 = arith.subf %25, %24 : vector<256x32xf32>
    %27 = math.exp %26 : vector<256x32xf32>
    %28 = math.log1p %27 : vector<256x32xf32>
    %29 = arith.addf %23, %28 : vector<256x32xf32>
    %c0_19 = arith.constant 0 : index
    %c0_20 = arith.constant 0 : index
    %30 = vector.load %arg8[%c0_19, %c0_20] : memref<256x32xf32, #tpu.memory_space<vmem>>, vector<256x32xf32>
    %31 = arith.mulf %29, %30 : vector<256x32xf32>
    %32 = arith.addf %20, %31 : vector<256x32xf32>
    %c0_21 = arith.constant 0 : index
    %c0_22 = arith.constant 0 : index
    %33 = vector.load %arg9[%c0_21, %c0_22] : memref<256x32xf32, #tpu.memory_space<vmem>>, vector<256x32xf32>
    tpu.vector_store %arg9[%c0_21, %c0_22], %32 {strides = array<i32>} : memref<256x32xf32, #tpu.memory_space<vmem>>, vector<256x32xf32>,
    %34 = math.log %29 : vector<256x32xf32>
    %35 = arith.mulf %30, %30 : vector<256x32xf32>
    %cst_23 = arith.constant 5.000000e-01 : f32
    %36 = vector.broadcast %cst_23 : f32 to vector<256x32xf32>
    %37 = arith.mulf %36, %35 : vector<256x32xf32>
    %38 = arith.addf %34, %37 : vector<256x32xf32>
    %39 = tpu.iota {dimensions = array<i32: 1>} : vector<2x32xi32>
    %40 = tpu.iota {dimensions = array<i32: 0>} : vector<2x32xi32>
    %c16_i32 = arith.constant 16 : i32
    %41 = vector.broadcast %c16_i32 : i32 to vector<2x32xi32>
    %42 = arith.muli %40, %41 : vector<2x32xi32>
    %43 = arith.cmpi sge, %39, %42 : vector<2x32xi32>
    %c16_i32_24 = arith.constant 16 : i32
    %44 = vector.broadcast %c16_i32_24 : i32 to vector<2x32xi32>
    %45 = arith.addi %42, %44 : vector<2x32xi32>
    %46 = arith.cmpi slt, %39, %45 : vector<2x32xi32>
    %47 = arith.andi %43, %46 : vector<2x32xi1>
    %48 = arith.extui %47 : vector<2x32xi1> to vector<2x32xi32>
    %49 = arith.sitofp %48 : vector<2x32xi32> to vector<2x32xf32>
    %cst_25 = arith.constant dense<0.000000e+00> : vector<2x256xf32>
    %50 = tpu.matmul %49, %38, %cst_25 {dimension_numbers = #tpu.dot_dimension_numbers<[1], [1], [0], [0], [0, 0, 1, 0], [], []>} : vector<2x32xf32>, vector<256x32xf32>, vector<2x256xf32> -> vector<2x256xf32>
    %cst_26 = arith.constant -14.7030163 : f32
    %51 = vector.broadcast %cst_26 : f32 to vector<2x256xf32>
    %52 = arith.subf %51, %50 : vector<2x256xf32>
    %c0_27 = arith.constant 0 : index
    %c0_28 = arith.constant 0 : index
    %53 = vector.load %arg10[%c0_27, %c0_28] : memref<2x256xf32, #tpu.memory_space<vmem>>, vector<2x256xf32>
    tpu.vector_store %arg10[%c0_27, %c0_28], %52 {strides = array<i32>} : memref<2x256xf32, #tpu.memory_space<vmem>>, vector<2x256xf32>,
    return
  }
  func.func @transform_0(%arg0: i32) -> (i32, i32) {
    %c0_i32 = arith.constant 0 : i32
    %c0_i32_0 = arith.constant 0 : i32
    return %arg0, %c0_i32 : i32, i32
  }
  func.func @transform_1(%arg0: i32) -> (i32, i32) {
    %c0_i32 = arith.constant 0 : i32
    %c0_i32_0 = arith.constant 0 : i32
    %c0_i32_1 = arith.constant 0 : i32
    return %c0_i32, %c0_i32_0 : i32, i32
  }
  func.func @transform_2(%arg0: i32) -> (i32, i32) {
    %c0_i32 = arith.constant 0 : i32
    %c0_i32_0 = arith.constant 0 : i32
    %c0_i32_1 = arith.constant 0 : i32
    return %c0_i32, %c0_i32_0 : i32, i32
  }
  func.func @transform_3(%arg0: i32) -> (i32, i32) {
    %c0_i32 = arith.constant 0 : i32
    %c0_i32_0 = arith.constant 0 : i32
    %c0_i32_1 = arith.constant 0 : i32
    return %c0_i32, %c0_i32_0 : i32, i32
  }
  func.func @transform_4(%arg0: i32) -> (i32, i32) {
    %c0_i32 = arith.constant 0 : i32
    %c0_i32_0 = arith.constant 0 : i32
    %c0_i32_1 = arith.constant 0 : i32
    return %c0_i32, %c0_i32_0 : i32, i32
  }
  func.func @transform_5(%arg0: i32) -> (i32, i32) {
    %c0_i32 = arith.constant 0 : i32
    %c0_i32_0 = arith.constant 0 : i32
    %c0_i32_1 = arith.constant 0 : i32
    return %c0_i32, %c0_i32_0 : i32, i32
  }
  func.func @transform_6(%arg0: i32) -> (i32, i32) {
    %c0_i32 = arith.constant 0 : i32
    %c0_i32_0 = arith.constant 0 : i32
    %c0_i32_1 = arith.constant 0 : i32
    return %c0_i32, %c0_i32_0 : i32, i32
  }
  func.func @transform_7(%arg0: i32) -> (i32, i32) {
    %c0_i32 = arith.constant 0 : i32
    %c0_i32_0 = arith.constant 0 : i32
    return %arg0, %c0_i32 : i32, i32
  }
  func.func @transform_8(%arg0: i32) -> (i32, i32) {
    %c0_i32 = arith.constant 0 : i32
    %c0_i32_0 = arith.constant 0 : i32
    return %arg0, %c0_i32 : i32, i32
  }
  func.func @transform_9(%arg0: i32) -> (i32, i32) {
    %c0_i32 = arith.constant 0 : i32
    %c0_i32_0 = arith.constant 0 : i32
    return %c0_i32, %arg0 : i32, i32
  }
}

</mosaic_0001>

<bundles_post_ra>
// kernel: variational_mean_field.1
= control target key start
LH: loop header
LB: loop body
LE: loop exit
PB: predicated region body
PF: predicated region fallthrough
CT: control target
= control target key end

     0   :  { %vm354_vm0 = vcmask 261120   ;;  %s3311_s22 = smov 32   ;;  %s3312_s28 = smov 96   ;;  %s4974_s1 = inlined_call_operand.vmem [shape: f32[128,32], index: 1, kind: input, shape index: {}]   ;;  %s4975_s0 = inlined_call_operand.vmem [shape: f32[256,128], index: 0, kind: input, shape index: {}]   ;;  %s4976_s3 = inlined_call_operand.vmem [shape: f32[32,32], index: 3, kind: input, shape index: {}]   ;;  %s4977_s5 = inlined_call_operand.vmem [shape: f32[32,64], index: 5, kind: input, shape index: {}]   ;;  %s4978_s2 = inlined_call_operand.vmem [shape: f32[1,32], index: 2, kind: input, shape index: {}]   ;;  %s4979_s7 = inlined_call_operand.vmem [shape: f32[256,32], index: 7, kind: input, shape index: {}]   ;;  %s4980_s4 = inlined_call_operand.vmem [shape: f32[1,32], index: 4, kind: input, shape index: {}]   ;;  %s4981_s6 = inlined_call_operand.vmem [shape: f32[1,64], index: 6, kind: input, shape index: {}]   ;;  %s4982_s8 = inlined_call_operand.vmem [shape: f32[256,32], index: 8, kind: output, shape index: {0}]   ;;  %s4983_s9 = inlined_call_operand.vmem [shape: f32[2,256], index: 9, kind: output, shape index: {1}]  }
   0x1   :  { %v63_v0 = vld [vmem:[%s4974_s1] sm:$0xff]  ;;  %v64_v1 = vld [vmem:[%s4974_s1 + $0x8] sm:$0xff]  ;;  %v65_v2 = vld [vmem:[%s4974_s1 + $0x10] sm:$0xff] }
   0x2   :  { %v2907_v3 = vpack.c.bf16 %v64_v1, %v63_v0  ;;  %v66_v4 = vld [vmem:[%s4974_s1 + $0x18] sm:$0xff]  ;;  %v67_v6 = vld [vmem:[%s4974_s1 + $0x20] sm:$0xff]  ;;  %v68_v7 = vld [vmem:[%s4974_s1 + $0x28] sm:$0xff] }
   0x3   :  { %v2911_v5 = vpack.c.bf16 %v66_v4, %v65_v2  ;;  %v2915_v8 = vpack.c.bf16 %v68_v7, %v67_v6  ;;  %v31_v9 = vld [vmem:[%s4975_s0] sm:$0xff]  ;;  %v69_v10 = vld [vmem:[%s4974_s1 + $0x30] sm:$0xff]  ;;  %v70_v11 = vld [vmem:[%s4974_s1 + $0x38] sm:$0xff] }
   0x4   :  { %2908 = vmatprep.subr.bf16.mxu0 %v2907_v3  ;;  %2747 = vmatprep.mubr.f32.mxu0 %v31_v9  ;;  %v2919_v12 = vpack.c.bf16 %v70_v11, %v69_v10  ;;  %v71_v13 = vld [vmem:[%s4974_s1 + $0x40] sm:$0xff]  ;;  %v72_v14 = vld [vmem:[%s4974_s1 + $0x48] sm:$0xff]  ;;  %v73_v16 = vld [vmem:[%s4974_s1 + $0x50] sm:$0xff] }
   0x5   :  { %2910 = vmatpush3.bf16.msra.mxu0 %v2907_v3  ;;  %v2923_v15 = vpack.c.bf16 %v72_v14, %v71_v13  ;;  %v74_v17 = vld [vmem:[%s4974_s1 + $0x58] sm:$0xff]  ;;  %v343_v18 = vld [vmem:[%s4976_s3] sm:$0xff]  ;;  %v344_v19 = vld [vmem:[%s4976_s3 + $0x8] sm:$0xff] }
   0x6   :  { %2912 = vmatprep.subr.bf16.mxu0 %v2911_v5  ;;  %v2927_v20 = vpack.c.bf16 %v74_v17, %v73_v16  ;;  %v2939_v21 = vpack.c.bf16 %v344_v19, %v343_v18  ;;  %v75_v22 = vld [vmem:[%s4974_s1 + $0x60] sm:$0xff]  ;;  %v76_v23 = vld [vmem:[%s4974_s1 + $0x68] sm:$0xff]  ;;  %v77_v25 = vld [vmem:[%s4974_s1 + $0x70] sm:$0xff] }
   0x7   :  { %v2931_v24 = vpack.c.bf16 %v76_v23, %v75_v22  ;;  %v78_v26 = vld [vmem:[%s4974_s1 + $0x78] sm:$0xff]  ;;  %v32_v28 = vld [vmem:[%s4975_s0 + $0x8] sm:$0xff]  ;;  %v33_v29 = vld [vmem:[%s4975_s0 + $0x10] sm:$0xff] }
   0x8   :  { %2940 = vmatprep.subr.bf16.mxu1 %v2939_v21  ;;  %v2935_v27 = vpack.c.bf16 %v78_v26, %v77_v25  ;;  %v34_v30 = vld [vmem:[%s4975_s0 + $0x18] sm:$0xff]  ;;  %v35_v31 = vld [vmem:[%s4975_s0 + $0x20] sm:$0xff]  ;;  %v36_v32 = vld [vmem:[%s4975_s0 + $0x28] sm:$0xff] }
   0x9   :  { %2914 = vmatpush3.bf16.msra.mxu0 %v2911_v5  ;;  %2942 = vmatpush3.bf16.msra.mxu1 %v2939_v21  ;;  %v37_v33 = vld [vmem:[%s4975_s0 + $0x30] sm:$0xff]  ;;  %v38_v34 = vld [vmem:[%s4975_s0 + $0x38] sm:$0xff]  ;;  %v39_v35 = vld [vmem:[%s4975_s0 + $0x40] sm:$0xff] }
   0xa   :  { %2916 = vmatprep.subr.bf16.mxu0 %v2915_v8  ;;  %v40_v36 = vld [vmem:[%s4975_s0 + $0x48] sm:$0xff]  ;;  %v41_v37 = vld [vmem:[%s4975_s0 + $0x50] sm:$0xff]  ;;  %v42_v38 = vld [vmem:[%s4975_s0 + $0x58] sm:$0xff] }
   0xb   :  { %v43_v39 = vld [vmem:[%s4975_s0 + $0x60] sm:$0xff]  ;;  %v44_v40 = vld [vmem:[%s4975_s0 + $0x68] sm:$0xff]  ;;  %v45_v41 = vld [vmem:[%s4975_s0 + $0x70] sm:$0xff] }
   0xc   :  { %v46_v42 = vld [vmem:[%s4975_s0 + $0x78] sm:$0xff]  ;;  %v47_v43 = vld [vmem:[%s4975_s0 + $0x80] sm:$0xff]  ;;  %v48_v44 = vld [vmem:[%s4975_s0 + $0x88] sm:$0xff] }
   0xd   :  { %2918 = vmatpush3.bf16.msra.mxu0 %v2915_v8  ;;  %v49_v45 = vld [vmem:[%s4975_s0 + $0x90] sm:$0xff]  ;;  %v50_v46 = vld [vmem:[%s4975_s0 + $0x98] sm:$0xff]  ;;  %v51_v47 = vld [vmem:[%s4975_s0 + $0xa0] sm:$0xff] }
   0xe   :  { %2920 = vmatprep.subr.bf16.mxu0 %v2919_v12  ;;  %v52_v48 = vld [vmem:[%s4975_s0 + $0xa8] sm:$0xff]  ;;  %v53_v49 = vld [vmem:[%s4975_s0 + $0xb0] sm:$0xff]  ;;  %v54_v50 = vld [vmem:[%s4975_s0 + $0xb8] sm:$0xff] }
   0xf   :  { %v55_v51 = vld [vmem:[%s4975_s0 + $0xc0] sm:$0xff]  ;;  %v56_v52 = vld [vmem:[%s4975_s0 + $0xc8] sm:$0xff]  ;;  %v57_v53 = vld [vmem:[%s4975_s0 + $0xd0] sm:$0xff] }
  0x10   :  { %v58_v54 = vld [vmem:[%s4975_s0 + $0xd8] sm:$0xff]  ;;  %v59_v55 = vld [vmem:[%s4975_s0 + $0xe0] sm:$0xff]  ;;  %v60_v56 = vld [vmem:[%s4975_s0 + $0xe8] sm:$0xff] }
  0x11   :  { %2922 = vmatpush3.bf16.msra.mxu0 %v2919_v12  ;;  %v61_v57 = vld [vmem:[%s4975_s0 + $0xf0] sm:$0xff]  ;;  %v62_v58 = vld [vmem:[%s4975_s0 + $0xf8] sm:$0xff]  ;;  %v708_v62 = vld [vmem:[%s4977_s5] sm:$0xff] }
  0x12   :  { %2924 = vmatprep.subr.bf16.mxu0 %v2923_v15  ;;  %v345_v59 = vld [vmem:[%s4976_s3 + $0x10] sm:$0xff]  ;;  %v346_v60 = vld [vmem:[%s4976_s3 + $0x18] sm:$0xff]  ;;  %v709_v63 = vld [vmem:[%s4977_s5 + $0x8] sm:$0xff] }
  0x13   :  { %v2943_v61 = vpack.c.bf16 %v346_v60, %v345_v59  ;;  %v2947_v0 = vpack.c.bf16 %v709_v63, %v708_v62  ;;  %v3529_v1 = vld [vmem:[%s4978_s2] ss:$0 sm:$0xff]  ;;  %v710_v6 = vld [vmem:[%s4977_s5 + $0x10] sm:$0xff]  ;;  %v711_v7 = vld [vmem:[%s4977_s5 + $0x18] sm:$0xff] }
  0x14   :  { %v2951_v13 = vpack.c.bf16 %v711_v7, %v710_v6 }
  0x15   :  { %2926 = vmatpush3.bf16.msra.mxu0 %v2923_v15  ;;  %2944 = vmatprep.subr.bf16.mxu1 %v2943_v61 }
  0x16   :  { %2928 = vmatprep.subr.bf16.mxu0 %v2927_v20  ;;  %2946 = vmatpush3.bf16.msra.mxu1 %v2943_v61 }
  0x17   :  { %2948 = vmatprep.subr.bf16.mxu1 %v2947_v0 }
  0x19   :  { %2930 = vmatpush3.bf16.msra.mxu0 %v2927_v20 }
  0x1a   :  { %2932 = vmatprep.subr.bf16.mxu0 %v2931_v24 }
  0x1d   :  { %2934 = vmatpush3.bf16.msra.mxu0 %v2931_v24 }
  0x1e   :  { %2936 = vmatprep.subr.bf16.mxu0 %v2935_v27 }
  0x21   :  { %2938 = vmatpush3.bf16.msra.mxu0 %v2935_v27 }
  0x24   :  { %2748 = vmatmul.mubr.f32.vlgmr.msra.gmra.mrb[0].mxu0 %v32_v28 }
  0x25   :  { %2750 = vmatprep.mubr.f32.mxu0 %v33_v29 }
  0x28   :  { %2751 = vmatmul.mubr.f32.gmra.mrb[2].mxu0 %v34_v30 }
  0x29   :  { %2753 = vmatprep.mubr.f32.mxu0 %v35_v31 }
  0x2c   :  { %2754 = vmatmul.mubr.f32.gmra.mrb[4].mxu0 %v36_v32 }
  0x2d   :  { %2756 = vmatprep.mubr.f32.mxu0 %v37_v33 }
  0x30   :  { %2757 = vmatmul.mubr.f32.gmra.mrb[6].mxu0 %v38_v34 }
  0x31   :  { %2759 = vmatprep.mubr.f32.mxu0 %v39_v35 }
  0x34   :  { %2760 = vmatmul.mubr.f32.gmra.mrb[8].mxu0 %v40_v36 }
  0x35   :  { %2762 = vmatprep.mubr.f32.mxu0 %v41_v37 }
  0x38   :  { %2763 = vmatmul.mubr.f32.gmra.mrb[10].mxu0 %v42_v38 }
  0x39   :  { %2765 = vmatprep.mubr.f32.mxu0 %v43_v39 }
  0x3c   :  { %2766 = vmatmul.mubr.f32.gmra.mrb[12].mxu0 %v44_v40 }
  0x3d   :  { %2768 = vmatprep.mubr.f32.mxu0 %v45_v41 }
  0x40   :  { %2769 = vmatmul.mubr.f32.gmra.mrb[14].mxu0 %v46_v42 }
  0x41   :  { %2771 = vmatprep.mubr.f32.mxu0 %v47_v43 }
  0x44   :  { %2772 = vmatmul.mubr.f32.gmra.mrb[16].mxu0 %v48_v44 }
  0x45   :  { %2774 = vmatprep.mubr.f32.mxu0 %v49_v45 }
  0x48   :  { %2775 = vmatmul.mubr.f32.gmra.mrb[18].mxu0 %v50_v46 }
  0x49   :  { %2777 = vmatprep.mubr.f32.mxu0 %v51_v47 }
  0x4c   :  { %2778 = vmatmul.mubr.f32.gmra.mrb[20].mxu0 %v52_v48 }
  0x4d   :  { %2780 = vmatprep.mubr.f32.mxu0 %v53_v49 }
  0x50   :  { %2781 = vmatmul.mubr.f32.gmra.mrb[22].mxu0 %v54_v50 }
  0x51   :  { %2783 = vmatprep.mubr.f32.mxu0 %v55_v51 }
  0x54   :  { %2784 = vmatmul.mubr.f32.gmra.mrb[24].mxu0 %v56_v52 }
  0x55   :  { %2786 = vmatprep.mubr.f32.mxu0 %v57_v53 }
  0x58   :  { %2787 = vmatmul.mubr.f32.gmra.mrb[26].mxu0 %v58_v54 }
  0x59   :  { %2789 = vmatprep.mubr.f32.mxu0 %v59_v55 }
  0x5c   :  { %2790 = vmatmul.mubr.f32.gmra.mrb[28].mxu0 %v60_v56 }
  0x5d   :  { %2792 = vmatprep.mubr.f32.mxu0 %v61_v57 }
  0x60   :  { %2793 = vmatmul.mubr.f32.gmra.mrb[30].mxu0 %v62_v58 }
  0xf7   :  { %v2749_v2 = vpop.f32.mrb[0].mxu0 }
  0xf8   :  { %v158_v3 = vadd.f32 %v2749_v2, %v3529_v1  ;;  %v152_v4 = vpop.f32.mrb[1].mxu0 }
  0xf9   :  { %v153_v5 = vadd.f32 %v3529_v1, %v152_v4 }
  0xfa   :  { %v312_v10 = vmax.f32 %v158_v3, 0.0 }
  0xfb   :  { %v311_v8 = vmax.f32 %v153_v5, 0.0  ;;  %v2752_v9 = vpop.f32.mrb[2].mxu0 }
  0xfc   :  { %v168_v11 = vadd.f32 %v2752_v9, %v3529_v1  ;;  %v162_v12 = vpop.f32.mrb[3].mxu0 }
  0xfd   :  { %v163_v14 = vadd.f32 %v3529_v1, %v162_v12  ;;  %2803 = vmatprep.mubr.msk.f32.mxu1 %vm354_vm0, %v311_v8 }
  0xfe   :  { %2804 = vmatmul.mubr.msk.f32.vlgmr.msra.gmra.mrb[0].mxu1 %vm354_vm0, %v312_v10  ;;  %v314_v17 = vmax.f32 %v168_v11, 0.0 }
  0xff   :  { %v313_v15 = vmax.f32 %v163_v14, 0.0  ;;  %v2755_v16 = vpop.f32.mrb[4].mxu0  ;;  %2950 = vmatpush3.bf16.msra.mxu1 %v2947_v0 }
 0x100   :  { %v178_v18 = vadd.f32 %v2755_v16, %v3529_v1  ;;  %v172_v19 = vpop.f32.mrb[5].mxu0  ;;  %2952 = vmatprep.subr.bf16.mxu1 %v2951_v13 }
 0x101   :  { %v173_v20 = vadd.f32 %v3529_v1, %v172_v19  ;;  %2806 = vmatprep.mubr.msk.f32.mxu1 %vm354_vm0, %v313_v15 }
 0x102   :  { %2807 = vmatmul.mubr.msk.f32.gmra.mrb[2].mxu1 %vm354_vm0, %v314_v17  ;;  %v316_v23 = vmax.f32 %v178_v18, 0.0 }
 0x103   :  { %v315_v21 = vmax.f32 %v173_v20, 0.0  ;;  %v2758_v22 = vpop.f32.mrb[6].mxu0  ;;  %2954 = vmatpush3.bf16.msra.mxu1 %v2951_v13 }
 0x104   :  { %v188_v24 = vadd.f32 %v2758_v22, %v3529_v1  ;;  %v182_v25 = vpop.f32.mrb[7].mxu0 }
 0x105   :  { %v183_v26 = vadd.f32 %v3529_v1, %v182_v25  ;;  %2809 = vmatprep.mubr.msk.f32.mxu1 %vm354_vm0, %v315_v21 }
 0x106   :  { %2810 = vmatmul.mubr.msk.f32.gmra.mrb[4].mxu1 %vm354_vm0, %v316_v23  ;;  %v318_v29 = vmax.f32 %v188_v24, 0.0 }
 0x107   :  { %v317_v27 = vmax.f32 %v183_v26, 0.0  ;;  %v2761_v28 = vpop.f32.mrb[8].mxu0 }
 0x108   :  { %v198_v30 = vadd.f32 %v2761_v28, %v3529_v1  ;;  %v192_v31 = vpop.f32.mrb[9].mxu0 }
 0x109   :  { %v193_v32 = vadd.f32 %v3529_v1, %v192_v31  ;;  %2812 = vmatprep.mubr.msk.f32.mxu1 %vm354_vm0, %v317_v27 }
 0x10a   :  { %2813 = vmatmul.mubr.msk.f32.gmra.mrb[6].mxu1 %vm354_vm0, %v318_v29  ;;  %v320_v35 = vmax.f32 %v198_v30, 0.0 }
 0x10b   :  { %v319_v33 = vmax.f32 %v193_v32, 0.0  ;;  %v2764_v34 = vpop.f32.mrb[10].mxu0 }
 0x10c   :  { %v208_v36 = vadd.f32 %v2764_v34, %v3529_v1  ;;  %v202_v37 = vpop.f32.mrb[11].mxu0 }
 0x10d   :  { %v203_v38 = vadd.f32 %v3529_v1, %v202_v37  ;;  %2815 = vmatprep.mubr.msk.f32.mxu1 %vm354_vm0, %v319_v33 }
 0x10e   :  { %2816 = vmatmul.mubr.msk.f32.gmra.mrb[8].mxu1 %vm354_vm0, %v320_v35  ;;  %v322_v41 = vmax.f32 %v208_v36, 0.0 }
 0x10f   :  { %v321_v39 = vmax.f32 %v203_v38, 0.0  ;;  %v2767_v40 = vpop.f32.mrb[12].mxu0  ;;  %v1520_v38 = vld [vmem:[%s4979_s7] sm:$0xff] }
 0x110   :  { %v218_v42 = vadd.f32 %v2767_v40, %v3529_v1  ;;  %v212_v43 = vpop.f32.mrb[13].mxu0  ;;  %v1968_v40 = vmul.f32 %v1520_v38, %v1520_v38  ;;  %v1531_v38 = vld [vmem:[%s4979_s7 + $0x58] sm:$0xff] }
 0x111   :  { %v213_v44 = vadd.f32 %v3529_v1, %v212_v43  ;;  %2818 = vmatprep.mubr.msk.f32.mxu1 %vm354_vm0, %v321_v39  ;;  %v1536_v39 = vld [vmem:[%s4979_s7 + $0x80] sm:$0xff]  ;;  %v1537_v43 = vld [vmem:[%s4979_s7 + $0x88] sm:$0xff] }
 0x112   :  { %2819 = vmatmul.mubr.msk.f32.gmra.mrb[10].mxu1 %vm354_vm0, %v322_v41  ;;  %v324_v47 = vmax.f32 %v218_v42, 0.0  ;;  %v1984_v41 = vmul.f32 %v1536_v39, %v1536_v39  ;;  %v1530_v39 = vld [vmem:[%s4979_s7 + $0x50] sm:$0xff] }
 0x113   :  { %v323_v45 = vmax.f32 %v213_v44, 0.0  ;;  %v2770_v46 = vpop.f32.mrb[14].mxu0  ;;  %v1985_v44 = vmul.f32 %v1537_v43, %v1537_v43  ;;  %v1549_v43 = vld [vmem:[%s4979_s7 + $0xe8] sm:$0xff] }
 0x114   :  { %v228_v48 = vadd.f32 %v2770_v46, %v3529_v1  ;;  %v222_v49 = vpop.f32.mrb[15].mxu0  ;;  %v1538_v46 = vld [vmem:[%s4979_s7 + $0x90] sm:$0xff] }
 0x115   :  { %v223_v50 = vadd.f32 %v3529_v1, %v222_v49  ;;  %2821 = vmatprep.mubr.msk.f32.mxu1 %vm354_vm0, %v323_v45  ;;  %v1539_v45 = vld [vmem:[%s4979_s7 + $0x98] sm:$0xff] }
 0x116   :  { %2822 = vmatmul.mubr.msk.f32.gmra.mrb[12].mxu1 %vm354_vm0, %v324_v47  ;;  %v326_v53 = vmax.f32 %v228_v48, 0.0  ;;  %v2000_v47 = vmul.f32 0.5, %v1968_v40  ;;  %v2016_v48 = vmul.f32 0.5, %v1984_v41  ;;  %v1979_v41 = vmul.f32 %v1531_v38, %v1531_v38 }
 0x117   :  { %v325_v51 = vmax.f32 %v223_v50, 0.0  ;;  %v2773_v52 = vpop.f32.mrb[16].mxu0  ;;  %v2017_v50 = vmul.f32 0.5, %v1985_v44  ;;  %v1548_v44 = vld [vmem:[%s4979_s7 + $0xe0] sm:$0xff] }
 0x118   :  { %v238_v54 = vadd.f32 %v2773_v52, %v3529_v1  ;;  %v232_v55 = vpop.f32.mrb[17].mxu0  ;;  %2064 = vrot.lane.b32.xlu1 %v2000_v47, %s3311_s22  ;;  %2096 = vrot.lane.b32.xlu0 %v2016_v48, %s3311_s22  ;;  %v1986_v52 = vmul.f32 %v1538_v46, %v1538_v46  ;;  %v1997_v47 = vmul.f32 %v1549_v43, %v1549_v43 }
 0x119   :  { %v233_v56 = vadd.f32 %v3529_v1, %v232_v55  ;;  %2824 = vmatprep.mubr.msk.f32.mxu1 %vm354_vm0, %v325_v51  ;;  %v1987_v51 = vmul.f32 %v1539_v45, %v1539_v45  ;;  %v2011_v45 = vmul.f32 0.5, %v1979_v41  ;;  %v1996_v48 = vmul.f32 %v1548_v44, %v1548_v44 }
 0x11a   :  { %2825 = vmatmul.mubr.msk.f32.gmra.mrb[14].mxu1 %vm354_vm0, %v326_v53  ;;  %v328_v59 = vmax.f32 %v238_v54, 0.0  ;;  %v1523_v53 = vld [vmem:[%s4979_s7 + $0x18] sm:$0xff]  ;;  %v1522_v54 = vld [vmem:[%s4979_s7 + $0x10] sm:$0xff] }
 0x11b   :  { %v327_v57 = vmax.f32 %v233_v56, 0.0  ;;  %v2776_v58 = vpop.f32.mrb[18].mxu0  ;;  %v2019_v55 = vmul.f32 0.5, %v1987_v51  ;;  %v2018_v56 = vmul.f32 0.5, %v1986_v52  ;;  %v2029_v51 = vmul.f32 0.5, %v1997_v47 }
 0x11c   :  { %v248_v60 = vadd.f32 %v2776_v58, %v3529_v1  ;;  %v242_v61 = vpop.f32.mrb[19].mxu0  ;;  %2098 = vrot.lane.b32.xlu0 %v2017_v50, %s3311_s22  ;;  %v1970_v58 = vmul.f32 %v1522_v54, %v1522_v54  ;;  %v1532_v50 = vld [vmem:[%s4979_s7 + $0x60] sm:$0xff]  ;;  %v2028_v52 = vmul.f32 0.5, %v1996_v48 }
 0x11d   :  { %v243_v62 = vadd.f32 %v3529_v1, %v242_v61  ;;  %2827 = vmatprep.mubr.msk.f32.mxu1 %vm354_vm0, %v327_v57  ;;  %v1971_v57 = vmul.f32 %v1523_v53, %v1523_v53  ;;  %v1980_v54 = vmul.f32 %v1532_v50, %v1532_v50 }
 0x11e   :  { %v330_v63 = vmax.f32 %v248_v60, 0.0  ;;  %2828 = vmatmul.mubr.msk.f32.gmra.mrb[16].mxu1 %vm354_vm0, %v328_v59  ;;  %v1541_v59 = vld [vmem:[%s4979_s7 + $0xa8] sm:$0xff]  ;;  %v1540_v60 = vld [vmem:[%s4979_s7 + $0xa0] sm:$0xff] }
 0x11f   :  { %v329_v0 = vmax.f32 %v243_v62, 0.0  ;;  %v2779_v2 = vpop.f32.mrb[20].mxu0  ;;  %v2003_v61 = vmul.f32 0.5, %v1971_v57  ;;  %v2002_v62 = vmul.f32 0.5, %v1970_v58  ;;  %v2012_v58 = vmul.f32 0.5, %v1980_v54 }
 0x120   :  { %v258_v3 = vadd.f32 %v2779_v2, %v3529_v1  ;;  %v252_v4 = vpop.f32.mrb[21].mxu0  ;;  %2100 = vrot.lane.b32.xlu0 %v2018_v56, %s3311_s22  ;;  %v1525_v2 = vld [vmem:[%s4979_s7 + $0x28] sm:$0xff]  ;;  %v1550_v56 = vld [vmem:[%s4979_s7 + $0xf0] sm:$0xff] }
 0x121   :  { %v253_v5 = vadd.f32 %v3529_v1, %v252_v4  ;;  %2830 = vmatprep.mubr.msk.f32.mxu1 %vm354_vm0, %v329_v0  ;;  %v1988_v0 = vmul.f32 %v1540_v60, %v1540_v60  ;;  %v1998_v60 = vmul.f32 %v1550_v56, %v1550_v56 }
 0x122   :  { %v332_v6 = vmax.f32 %v258_v3, 0.0  ;;  %2831 = vmatmul.mubr.msk.f32.gmra.mrb[18].mxu1 %vm354_vm0, %v330_v63  ;;  %v1989_v63 = vmul.f32 %v1541_v59, %v1541_v59  ;;  %v1524_v3 = vld [vmem:[%s4979_s7 + $0x20] sm:$0xff] }
 0x123   :  { %v331_v7 = vmax.f32 %v253_v5, 0.0  ;;  %v2782_v8 = vpop.f32.mrb[22].mxu0  ;;  %v2020_v5 = vmul.f32 0.5, %v1988_v0  ;;  %v2030_v0 = vmul.f32 0.5, %v1998_v60 }
 0x124   :  { %v268_v9 = vadd.f32 %v2782_v8, %v3529_v1  ;;  %v262_v10 = vpop.f32.mrb[23].mxu0  ;;  %2068 = vrot.lane.b32.xlu0 %v2002_v62, %s3311_s22  ;;  %v2021_v4 = vmul.f32 0.5, %v1989_v63  ;;  %v1543_v8 = vld [vmem:[%s4979_s7 + $0xb8] sm:$0xff]  ;;  %v1534_v62 = vld [vmem:[%s4979_s7 + $0x70] sm:$0xff] }
 0x125   :  { %v263_v11 = vadd.f32 %v3529_v1, %v262_v10  ;;  %2833 = vmatprep.mubr.msk.f32.mxu1 %vm354_vm0, %v331_v7  ;;  %v1972_v7 = vmul.f32 %v1524_v3, %v1524_v3  ;;  %v1982_v3 = vmul.f32 %v1534_v62, %v1534_v62 }
 0x126   :  { %v334_v12 = vmax.f32 %v268_v9, 0.0  ;;  %2834 = vmatmul.mubr.msk.f32.gmra.mrb[20].mxu1 %vm354_vm0, %v332_v6  ;;  %v1973_v6 = vmul.f32 %v1525_v2, %v1525_v2  ;;  %v1542_v9 = vld [vmem:[%s4979_s7 + $0xb0] sm:$0xff] }
 0x127   :  { %v333_v13 = vmax.f32 %v263_v11, 0.0  ;;  %v2785_v14 = vpop.f32.mrb[24].mxu0  ;;  %v2004_v11 = vmul.f32 0.5, %v1972_v7 }
 0x128   :  { %v278_v15 = vadd.f32 %v2785_v14, %v3529_v1  ;;  %v272_v16 = vpop.f32.mrb[25].mxu0  ;;  %2104 = vrot.lane.b32.xlu0 %v2020_v5, %s3311_s22  ;;  %v2005_v10 = vmul.f32 0.5, %v1973_v6  ;;  %v1527_v14 = vld [vmem:[%s4979_s7 + $0x38] sm:$0xff] }
 0x129   :  { %v273_v17 = vadd.f32 %v3529_v1, %v272_v16  ;;  %2836 = vmatprep.mubr.msk.f32.mxu1 %vm354_vm0, %v333_v13  ;;  %v1990_v13 = vmul.f32 %v1542_v9, %v1542_v9  ;;  %v2014_v9 = vmul.f32 0.5, %v1982_v3 }
 0x12a   :  { %v336_v18 = vmax.f32 %v278_v15, 0.0  ;;  %2837 = vmatmul.mubr.msk.f32.gmra.mrb[22].mxu1 %vm354_vm0, %v334_v12  ;;  %v1991_v12 = vmul.f32 %v1543_v8, %v1543_v8  ;;  %v1526_v15 = vld [vmem:[%s4979_s7 + $0x30] sm:$0xff] }
 0x12b   :  { %v335_v19 = vmax.f32 %v273_v17, 0.0  ;;  %v2788_v20 = vpop.f32.mrb[26].mxu0  ;;  %v2022_v17 = vmul.f32 0.5, %v1990_v13 }
 0x12c   :  { %v288_v21 = vadd.f32 %v2788_v20, %v3529_v1  ;;  %v282_v22 = vpop.f32.mrb[27].mxu0  ;;  %2072 = vrot.lane.b32.xlu0 %v2004_v11, %s3311_s22  ;;  %v2023_v16 = vmul.f32 0.5, %v1991_v12  ;;  %v1545_v20 = vld [vmem:[%s4979_s7 + $0xc8] sm:$0xff] }
 0x12d   :  { %v283_v23 = vadd.f32 %v3529_v1, %v282_v22  ;;  %2839 = vmatprep.mubr.msk.f32.mxu1 %vm354_vm0, %v335_v19  ;;  %v1974_v19 = vmul.f32 %v1526_v15, %v1526_v15 }
 0x12e   :  { %v338_v24 = vmax.f32 %v288_v21, 0.0  ;;  %2840 = vmatmul.mubr.msk.f32.gmra.mrb[24].mxu1 %vm354_vm0, %v336_v18  ;;  %v1975_v18 = vmul.f32 %v1527_v14, %v1527_v14  ;;  %v1544_v21 = vld [vmem:[%s4979_s7 + $0xc0] sm:$0xff] }
 0x12f   :  { %v337_v25 = vmax.f32 %v283_v23, 0.0  ;;  %v2791_v26 = vpop.f32.mrb[28].mxu0  ;;  %v2006_v23 = vmul.f32 0.5, %v1974_v19 }
 0x130   :  { %v298_v27 = vadd.f32 %v2791_v26, %v3529_v1  ;;  %v292_v28 = vpop.f32.mrb[29].mxu0  ;;  %2108 = vrot.lane.b32.xlu0 %v2022_v17, %s3311_s22  ;;  %v2007_v22 = vmul.f32 0.5, %v1975_v18  ;;  %v1529_v26 = vld [vmem:[%s4979_s7 + $0x48] sm:$0xff] }
 0x131   :  { %v293_v29 = vadd.f32 %v3529_v1, %v292_v28  ;;  %2842 = vmatprep.mubr.msk.f32.mxu1 %vm354_vm0, %v337_v25  ;;  %v1992_v25 = vmul.f32 %v1544_v21, %v1544_v21 }
 0x132   :  { %v340_v30 = vmax.f32 %v298_v27, 0.0  ;;  %2843 = vmatmul.mubr.msk.f32.gmra.mrb[26].mxu1 %vm354_vm0, %v338_v24  ;;  %v1993_v24 = vmul.f32 %v1545_v20, %v1545_v20  ;;  %v1528_v27 = vld [vmem:[%s4979_s7 + $0x40] sm:$0xff] }
 0x133   :  { %v339_v31 = vmax.f32 %v293_v29, 0.0  ;;  %v2794_v32 = vpop.f32.mrb[30].mxu0  ;;  %v2024_v29 = vmul.f32 0.5, %v1992_v25 }
 0x134   :  { %v308_v33 = vadd.f32 %v2794_v32, %v3529_v1  ;;  %v302_v34 = vpop.f32.mrb[31].mxu0  ;;  %2076 = vrot.lane.b32.xlu0 %v2006_v23, %s3311_s22  ;;  %v2025_v28 = vmul.f32 0.5, %v1993_v24  ;;  %v1547_v32 = vld [vmem:[%s4979_s7 + $0xd8] sm:$0xff] }
 0x135   :  { %v303_v35 = vadd.f32 %v3529_v1, %v302_v34  ;;  %2845 = vmatprep.mubr.msk.f32.mxu1 %vm354_vm0, %v339_v31  ;;  %v1521_v1 = vld [vmem:[%s4979_s7 + $0x8] sm:$0xff]  ;;  %v1976_v31 = vmul.f32 %v1528_v27, %v1528_v27 }
 0x136   :  { %v342_v36 = vmax.f32 %v308_v33, 0.0  ;;  %2846 = vmatmul.mubr.msk.f32.gmra.mrb[28].mxu1 %vm354_vm0, %v340_v30  ;;  %v1969_v42 = vmul.f32 %v1521_v1, %v1521_v1  ;;  %v1977_v30 = vmul.f32 %v1529_v26, %v1529_v26  ;;  %v1546_v33 = vld [vmem:[%s4979_s7 + $0xd0] sm:$0xff] }
 0x137   :  { %v341_v37 = vmax.f32 %v303_v35, 0.0  ;;  %v2008_v35 = vmul.f32 0.5, %v1976_v31 }
 0x138   :  { %v2001_v49 = vmul.f32 0.5, %v1969_v42  ;;  %2112 = vrot.lane.b32.xlu0 %v2024_v29, %s3311_s22  ;;  %v2009_v34 = vmul.f32 0.5, %v1977_v30  ;;  %v1978_v42 = vmul.f32 %v1530_v39, %v1530_v39 }
 0x139   :  { %2848 = vmatprep.mubr.msk.f32.mxu1 %vm354_vm0, %v341_v37  ;;  %v1994_v37 = vmul.f32 %v1546_v33, %v1546_v33 }
 0x13a   :  { %2849 = vmatmul.mubr.msk.f32.gmra.mrb[30].mxu1 %vm354_vm0, %v342_v36  ;;  %2066 = vrot.lane.b32.xlu1 %v2001_v49, %s3311_s22  ;;  %v1995_v36 = vmul.f32 %v1547_v32, %v1547_v32  ;;  %v2010_v46 = vmul.f32 0.5, %v1978_v42  ;;  %v1533_v49 = vld [vmem:[%s4979_s7 + $0x68] sm:$0xff] }
 0x13b   :  { %v2026_v40 = vmul.f32 0.5, %v1994_v37  ;;  %v1981_v53 = vmul.f32 %v1533_v49, %v1533_v49 }
 0x13c   :  { %2080 = vrot.lane.b32.xlu0 %v2008_v35, %s3311_s22  ;;  %v2027_v1 = vmul.f32 0.5, %v1995_v36 }
 0x13d   :  { %v2013_v57 = vmul.f32 0.5, %v1981_v53 }
 0x13e   :  { %2102 = vrot.lane.b32.xlu1 %v2019_v55, %s3311_s22  ;;  %v1551_v55 = vld [vmem:[%s4979_s7 + $0xf8] sm:$0xff] }
 0x13f   :  { %v1999_v59 = vmul.f32 %v1551_v55, %v1551_v55 }
 0x140   :  { %2116 = vrot.lane.b32.xlu0 %v2026_v40, %s3311_s22 }
 0x141   :  { %v2031_v63 = vmul.f32 0.5, %v1999_v59 }
 0x142   :  { %2070 = vrot.lane.b32.xlu1 %v2003_v61, %s3311_s22  ;;  %v1535_v61 = vld [vmem:[%s4979_s7 + $0x78] sm:$0xff] }
 0x143   :  { %v1983_v2 = vmul.f32 %v1535_v61, %v1535_v61 }
 0x144   :  { %2084 = vrot.lane.b32.xlu0 %v2010_v46, %s3311_s22 }
 0x145   :  { %v2015_v8 = vmul.f32 0.5, %v1983_v2 }
 0x146   :  { %2106 = vrot.lane.b32.xlu1 %v2021_v4, %s3311_s22  ;;  %v3728_v4 = vld [vmem:[%s4980_s4] ss:$0 sm:$0xff] }
 0x148   :  { %2120 = vrot.lane.b32.xlu0 %v2028_v52, %s3311_s22 }
 0x14a   :  { %2074 = vrot.lane.b32.xlu1 %v2005_v10, %s3311_s22 }
 0x14c   :  { %2088 = vrot.lane.b32.xlu0 %v2012_v58, %s3311_s22 }
 0x14e   :  { %2110 = vrot.lane.b32.xlu1 %v2023_v16, %s3311_s22 }
 0x150   :  { %2124 = vrot.lane.b32.xlu0 %v2030_v0, %s3311_s22 }
 0x152   :  { %2078 = vrot.lane.b32.xlu1 %v2007_v22, %s3311_s22 }
 0x154   :  { %2092 = vrot.lane.b32.xlu0 %v2014_v9, %s3311_s22 }
 0x156   :  { %2114 = vrot.lane.b32.xlu1 %v2025_v28, %s3311_s22 }
 0x15a   :  { %2082 = vrot.lane.b32.xlu1 %v2009_v34, %s3311_s22 }
 0x15e   :  { %2118 = vrot.lane.b32.xlu1 %v2027_v1, %s3311_s22 }
 0x162   :  { %2086 = vrot.lane.b32.xlu1 %v2011_v45, %s3311_s22 }
 0x166   :  { %2122 = vrot.lane.b32.xlu1 %v2029_v51, %s3311_s22 }
 0x16a   :  { %2090 = vrot.lane.b32.xlu1 %v2013_v57, %s3311_s22 }
 0x16e   :  { %2126 = vrot.lane.b32.xlu1 %v2031_v63, %s3311_s22 }
 0x172   :  { %2094 = vrot.lane.b32.xlu1 %v2015_v8, %s3311_s22 }
 0x1d1   :  { %v2805_v5 = vpop.f32.mrb[0].mxu1 }
 0x1d2   :  { %v523_v6 = vadd.f32 %v2805_v5, %v3728_v4  ;;  %v517_v7 = vpop.f32.mrb[1].mxu1 }
 0x1d3   :  { %v518_v10 = vadd.f32 %v3728_v4, %v517_v7 }
 0x1d4   :  { %v677_v13 = vmax.f32 %v523_v6, 0.0 }
 0x1d5   :  { %v676_v11 = vmax.f32 %v518_v10, 0.0  ;;  %v2808_v12 = vpop.f32.mrb[2].mxu1 }
 0x1d6   :  { %v533_v14 = vadd.f32 %v2808_v12, %v3728_v4  ;;  %v527_v15 = vpop.f32.mrb[3].mxu1 }
 0x1d7   :  { %v528_v16 = vadd.f32 %v3728_v4, %v527_v15  ;;  %2859 = vmatprep.mubr.msk.f32.mxu1 %vm354_vm0, %v676_v11 }
 0x1d8   :  { %2860 = vmatmul.mubr.msk.f32.vlgmr.msra.gmra.mrb[32].mxu1 %vm354_vm0, %v677_v13  ;;  %v679_v19 = vmax.f32 %v533_v14, 0.0 }
 0x1d9   :  { %v678_v17 = vmax.f32 %v528_v16, 0.0  ;;  %v2811_v18 = vpop.f32.mrb[4].mxu1 }
 0x1da   :  { %v543_v20 = vadd.f32 %v2811_v18, %v3728_v4  ;;  %v537_v21 = vpop.f32.mrb[5].mxu1 }
 0x1db   :  { %v538_v22 = vadd.f32 %v3728_v4, %v537_v21  ;;  %2862 = vmatprep.mubr.msk.f32.mxu1 %vm354_vm0, %v678_v17 }
 0x1dc   :  { %2863 = vmatmul.mubr.msk.f32.gmra.mrb[34].mxu1 %vm354_vm0, %v679_v19  ;;  %v681_v25 = vmax.f32 %v543_v20, 0.0 }
 0x1dd   :  { %v680_v23 = vmax.f32 %v538_v22, 0.0  ;;  %v2814_v24 = vpop.f32.mrb[6].mxu1 }
 0x1de   :  { %v553_v26 = vadd.f32 %v2814_v24, %v3728_v4  ;;  %v547_v27 = vpop.f32.mrb[7].mxu1 }
 0x1df   :  { %v548_v28 = vadd.f32 %v3728_v4, %v547_v27  ;;  %2865 = vmatprep.mubr.msk.f32.mxu1 %vm354_vm0, %v680_v23 }
 0x1e0   :  { %2866 = vmatmul.mubr.msk.f32.gmra.mrb[36].mxu1 %vm354_vm0, %v681_v25  ;;  %v683_v31 = vmax.f32 %v553_v26, 0.0 }
 0x1e1   :  { %v682_v29 = vmax.f32 %v548_v28, 0.0  ;;  %v2817_v30 = vpop.f32.mrb[8].mxu1 }
 0x1e2   :  { %v563_v32 = vadd.f32 %v2817_v30, %v3728_v4  ;;  %v557_v33 = vpop.f32.mrb[9].mxu1 }
 0x1e3   :  { %v558_v34 = vadd.f32 %v3728_v4, %v557_v33  ;;  %2868 = vmatprep.mubr.msk.f32.mxu1 %vm354_vm0, %v682_v29 }
 0x1e4   :  { %2869 = vmatmul.mubr.msk.f32.gmra.mrb[38].mxu1 %vm354_vm0, %v683_v31  ;;  %v685_v37 = vmax.f32 %v563_v32, 0.0 }
 0x1e5   :  { %v684_v35 = vmax.f32 %v558_v34, 0.0  ;;  %v2820_v36 = vpop.f32.mrb[10].mxu1 }
 0x1e6   :  { %v573_v38 = vadd.f32 %v2820_v36, %v3728_v4  ;;  %v567_v39 = vpop.f32.mrb[11].mxu1 }
 0x1e7   :  { %v568_v1 = vadd.f32 %v3728_v4, %v567_v39  ;;  %2871 = vmatprep.mubr.msk.f32.mxu1 %vm354_vm0, %v684_v35 }
 0x1e8   :  { %2872 = vmatmul.mubr.msk.f32.gmra.mrb[40].mxu1 %vm354_vm0, %v685_v37  ;;  %v687_v42 = vmax.f32 %v573_v38, 0.0 }
 0x1e9   :  { %v686_v40 = vmax.f32 %v568_v1, 0.0  ;;  %v2823_v41 = vpop.f32.mrb[12].mxu1  ;;  %v3801_v1 = vld [vmem:[%s4981_s6] ss:$0 sm:$0xff] }
 0x1ea   :  { %v583_v43 = vadd.f32 %v2823_v41, %v3728_v4  ;;  %v577_v44 = vpop.f32.mrb[13].mxu1 }
 0x1eb   :  { %v578_v45 = vadd.f32 %v3728_v4, %v577_v44  ;;  %2874 = vmatprep.mubr.msk.f32.mxu1 %vm354_vm0, %v686_v40 }
 0x1ec   :  { %2875 = vmatmul.mubr.msk.f32.gmra.mrb[42].mxu1 %vm354_vm0, %v687_v42  ;;  %v689_v48 = vmax.f32 %v583_v43, 0.0 }
 0x1ed   :  { %v688_v46 = vmax.f32 %v578_v45, 0.0  ;;  %v2826_v47 = vpop.f32.mrb[14].mxu1 }
 0x1ee   :  { %v593_v49 = vadd.f32 %v2826_v47, %v3728_v4  ;;  %v587_v50 = vpop.f32.mrb[15].mxu1 }
 0x1ef   :  { %v588_v51 = vadd.f32 %v3728_v4, %v587_v50  ;;  %2877 = vmatprep.mubr.msk.f32.mxu1 %vm354_vm0, %v688_v46 }
 0x1f0   :  { %2878 = vmatmul.mubr.msk.f32.gmra.mrb[44].mxu1 %vm354_vm0, %v689_v48  ;;  %v691_v54 = vmax.f32 %v593_v49, 0.0 }
 0x1f1   :  { %v690_v52 = vmax.f32 %v588_v51, 0.0  ;;  %v2829_v53 = vpop.f32.mrb[16].mxu1 }
 0x1f2   :  { %v603_v55 = vadd.f32 %v2829_v53, %v3728_v4  ;;  %v597_v56 = vpop.f32.mrb[17].mxu1 }
 0x1f3   :  { %v598_v57 = vadd.f32 %v3728_v4, %v597_v56  ;;  %2880 = vmatprep.mubr.msk.f32.mxu1 %vm354_vm0, %v690_v52 }
 0x1f4   :  { %2881 = vmatmul.mubr.msk.f32.gmra.mrb[46].mxu1 %vm354_vm0, %v691_v54  ;;  %v693_v60 = vmax.f32 %v603_v55, 0.0 }
 0x1f5   :  { %v692_v58 = vmax.f32 %v598_v57, 0.0  ;;  %v2832_v59 = vpop.f32.mrb[18].mxu1 }
 0x1f6   :  { %v613_v61 = vadd.f32 %v2832_v59, %v3728_v4  ;;  %v607_v62 = vpop.f32.mrb[19].mxu1 }
 0x1f7   :  { %v608_v63 = vadd.f32 %v3728_v4, %v607_v62  ;;  %2883 = vmatprep.mubr.msk.f32.mxu1 %vm354_vm0, %v692_v58 }
 0x1f8   :  { %v695_v0 = vmax.f32 %v613_v61, 0.0  ;;  %2884 = vmatmul.mubr.msk.f32.gmra.mrb[48].mxu1 %vm354_vm0, %v693_v60 }
 0x1f9   :  { %v694_v2 = vmax.f32 %v608_v63, 0.0  ;;  %v2835_v3 = vpop.f32.mrb[20].mxu1 }
 0x1fa   :  { %v623_v5 = vadd.f32 %v2835_v3, %v3728_v4  ;;  %v617_v6 = vpop.f32.mrb[21].mxu1 }
 0x1fb   :  { %v618_v7 = vadd.f32 %v3728_v4, %v617_v6  ;;  %2886 = vmatprep.mubr.msk.f32.mxu1 %vm354_vm0, %v694_v2 }
 0x1fc   :  { %v697_v8 = vmax.f32 %v623_v5, 0.0  ;;  %2887 = vmatmul.mubr.msk.f32.gmra.mrb[50].mxu1 %vm354_vm0, %v695_v0 }
 0x1fd   :  { %v696_v9 = vmax.f32 %v618_v7, 0.0  ;;  %v2838_v10 = vpop.f32.mrb[22].mxu1 }
 0x1fe   :  { %v633_v11 = vadd.f32 %v2838_v10, %v3728_v4  ;;  %v627_v12 = vpop.f32.mrb[23].mxu1 }
 0x1ff   :  { %v628_v13 = vadd.f32 %v3728_v4, %v627_v12  ;;  %2889 = vmatprep.mubr.msk.f32.mxu1 %vm354_vm0, %v696_v9 }
 0x200   :  { %v699_v14 = vmax.f32 %v633_v11, 0.0  ;;  %2890 = vmatmul.mubr.msk.f32.gmra.mrb[52].mxu1 %vm354_vm0, %v697_v8 }
 0x201   :  { %v698_v15 = vmax.f32 %v628_v13, 0.0  ;;  %v2841_v16 = vpop.f32.mrb[24].mxu1 }
 0x202   :  { %v643_v17 = vadd.f32 %v2841_v16, %v3728_v4  ;;  %v637_v18 = vpop.f32.mrb[25].mxu1 }
 0x203   :  { %v638_v19 = vadd.f32 %v3728_v4, %v637_v18  ;;  %2892 = vmatprep.mubr.msk.f32.mxu1 %vm354_vm0, %v698_v15 }
 0x204   :  { %v701_v20 = vmax.f32 %v643_v17, 0.0  ;;  %2893 = vmatmul.mubr.msk.f32.gmra.mrb[54].mxu1 %vm354_vm0, %v699_v14 }
 0x205   :  { %v700_v21 = vmax.f32 %v638_v19, 0.0  ;;  %v2844_v22 = vpop.f32.mrb[26].mxu1 }
 0x206   :  { %v653_v23 = vadd.f32 %v2844_v22, %v3728_v4  ;;  %v647_v24 = vpop.f32.mrb[27].mxu1 }
 0x207   :  { %v648_v25 = vadd.f32 %v3728_v4, %v647_v24  ;;  %2895 = vmatprep.mubr.msk.f32.mxu1 %vm354_vm0, %v700_v21 }
 0x208   :  { %v703_v26 = vmax.f32 %v653_v23, 0.0  ;;  %2896 = vmatmul.mubr.msk.f32.gmra.mrb[56].mxu1 %vm354_vm0, %v701_v20 }
 0x209   :  { %v702_v27 = vmax.f32 %v648_v25, 0.0  ;;  %v2847_v28 = vpop.f32.mrb[28].mxu1 }
 0x20a   :  { %v663_v29 = vadd.f32 %v2847_v28, %v3728_v4  ;;  %v657_v30 = vpop.f32.mrb[29].mxu1 }
 0x20b   :  { %v658_v31 = vadd.f32 %v3728_v4, %v657_v30  ;;  %2898 = vmatprep.mubr.msk.f32.mxu1 %vm354_vm0, %v702_v27 }
 0x20c   :  { %v705_v32 = vmax.f32 %v663_v29, 0.0  ;;  %2899 = vmatmul.mubr.msk.f32.gmra.mrb[58].mxu1 %vm354_vm0, %v703_v26 }
 0x20d   :  { %v704_v33 = vmax.f32 %v658_v31, 0.0  ;;  %v2850_v34 = vpop.f32.mrb[30].mxu1 }
 0x20e   :  { %v673_v35 = vadd.f32 %v2850_v34, %v3728_v4  ;;  %v667_v36 = vpop.f32.mrb[31].mxu1 }
 0x20f   :  { %v668_v37 = vadd.f32 %v3728_v4, %v667_v36  ;;  %2901 = vmatprep.mubr.msk.f32.mxu1 %vm354_vm0, %v704_v33 }
 0x210   :  { %v707_v38 = vmax.f32 %v673_v35, 0.0  ;;  %2902 = vmatmul.mubr.msk.f32.gmra.mrb[60].mxu1 %vm354_vm0, %v705_v32 }
 0x211   :  { %v706_v39 = vmax.f32 %v668_v37, 0.0 }
 0x213   :  { %2904 = vmatprep.mubr.msk.f32.mxu1 %vm354_vm0, %v706_v39 }
 0x214   :  { %2905 = vmatmul.mubr.msk.f32.gmra.mrb[62].mxu1 %vm354_vm0, %v707_v38 }
 0x2ab   :  { %v2861_v40 = vpop.f32.mrb[32].mxu1 }
 0x2ac   :  { %v3804_v41 = vadd.f32 %v2861_v40, %v3801_v1  ;;  %v881_v4 = vpop.f32.mrb[33].mxu1 }
 0x2ad   :  { %v3807_v42 = vadd.f32 %v3801_v1, %v881_v4 }
 0x2ae   :  { %5020 = vst [vmem:[#allocation2_spill] sm:$0xff] %v3804_v41  ;;  %v1073_v43 = vand.u32 2147483647, %v3804_v41  ;;  %v1041_v21 = vmax.f32 %v3804_v41, 0.0 }
 0x2af   :  { %5021 = vst [vmem:[#allocation3_spill] sm:$0xff] %v3807_v42  ;;  %v1072_v44 = vand.u32 2147483647, %v3807_v42  ;;  %v2864_v45 = vpop.f32.mrb[34].mxu1  ;;  %v1040_v22 = vmax.f32 %v3807_v42, 0.0 }
 0x2b0   :  { %v1105_v46 = vsub.f32 0.0, %v1073_v43  ;;  %v3812_v47 = vadd.f32 %v2864_v45, %v3801_v1  ;;  %v891_v48 = vpop.f32.mrb[35].mxu1 }
 0x2b1   :  { %v1104_v49 = vsub.f32 0.0, %v1072_v44  ;;  %v3815_v50 = vadd.f32 %v3801_v1, %v891_v48 }
 0x2b2   :  { %5022 = vst [vmem:[#allocation4_spill] sm:$0xff] %v3812_v47  ;;  %v1138_v51 = vmul.f32 1.442695, %v1105_v46  ;;  %v1075_v52 = vand.u32 2147483647, %v3812_v47  ;;  %v1043_v25 = vmax.f32 %v3812_v47, 0.0 }
 0x2b3   :  { %5023 = vst [vmem:[#allocation5_spill] sm:$0xff] %v3815_v50  ;;  %v1136_v53 = vmul.f32 1.442695, %v1104_v49  ;;  %v1074_v54 = vand.u32 2147483647, %v3815_v50  ;;  %v2867_v55 = vpop.f32.mrb[36].mxu1 }
 0x2b4   :  { %3086 = vpow2.f32 %v1138_v51  ;;  %v1107_v56 = vsub.f32 0.0, %v1075_v52  ;;  %v3820_v57 = vadd.f32 %v2867_v55, %v3801_v1  ;;  %v901_v58 = vpop.f32.mrb[37].mxu1  ;;  %v1042_v26 = vmax.f32 %v3815_v50, 0.0 }
 0x2b5   :  { %3088 = vpow2.f32 %v1136_v53  ;;  %v1106_v59 = vsub.f32 0.0, %v1074_v54  ;;  %v3823_v60 = vadd.f32 %v3801_v1, %v901_v58 }
 0x2b6   :  { %5024 = vst [vmem:[#allocation6_spill] sm:$0xff] %v3820_v57  ;;  %v1142_v61 = vmul.f32 1.442695, %v1107_v56  ;;  %v1077_v62 = vand.u32 2147483647, %v3820_v57  ;;  %v1045_v36 = vmax.f32 %v3820_v57, 0.0 }
 0x2b7   :  { %5025 = vst [vmem:[#allocation7_spill] sm:$0xff] %v3823_v60  ;;  %v1140_v63 = vmul.f32 1.442695, %v1106_v59  ;;  %v1076_v0 = vand.u32 2147483647, %v3823_v60  ;;  %v2870_v2 = vpop.f32.mrb[38].mxu1 }
 0x2b8   :  { %3090 = vpow2.f32 %v1142_v61  ;;  %v1109_v3 = vsub.f32 0.0, %v1077_v62  ;;  %v3828_v5 = vadd.f32 %v2870_v2, %v3801_v1  ;;  %v911_v6 = vpop.f32.mrb[39].mxu1  ;;  %v1044_v37 = vmax.f32 %v3823_v60, 0.0 }
 0x2b9   :  { %3092 = vpow2.f32 %v1140_v63  ;;  %v1108_v7 = vsub.f32 0.0, %v1076_v0  ;;  %v3831_v8 = vadd.f32 %v3801_v1, %v911_v6 }
 0x2ba   :  { %5026 = vst [vmem:[#allocation8_spill] sm:$0xff] %v3828_v5  ;;  %v1146_v9 = vmul.f32 1.442695, %v1109_v3  ;;  %v1079_v10 = vand.u32 2147483647, %v3828_v5  ;;  %v1047_v4 = vmax.f32 %v3828_v5, 0.0 }
 0x2bb   :  { %5027 = vst [vmem:[#allocation9_spill] sm:$0xff] %v3831_v8  ;;  %v1144_v11 = vmul.f32 1.442695, %v1108_v7  ;;  %v2873_v12 = vpop.f32.mrb[40].mxu1  ;;  %v1078_v15 = vand.u32 2147483647, %v3831_v8 }
 0x2bc   :  { %3094 = vpow2.f32 %v1146_v9  ;;  %v1111_v13 = vsub.f32 0.0, %v1079_v10  ;;  %v921_v14 = vpop.f32.mrb[41].mxu1  ;;  %v3836_v18 = vadd.f32 %v2873_v12, %v3801_v1 }
 0x2bd   :  { %3096 = vpow2.f32 %v1144_v11  ;;  %v1110_v27 = vsub.f32 0.0, %v1078_v15  ;;  %v3846_v32 = vadd.f32 %v3801_v1, %v921_v14 }
 0x2be   :  { %v3087_v16 = vpop.eup %3086  ;;  %v1150_v17 = vmul.f32 1.442695, %v1111_v13  ;;  %5028 = vst [vmem:[#allocation10_spill] sm:$0xff] %v3836_v18  ;;  %v1081_v31 = vand.u32 2147483647, %v3836_v18 }
 0x2bf   :  { %v3089_v19 = vpop.eup %3088  ;;  %v1209_v20 = vadd.f32 1.0, %v3087_v16  ;;  %v2876_v24 = vpop.f32.mrb[42].mxu1  ;;  %v1212_v30 = vmul.f32 -0.5, %v3087_v16  ;;  %5029 = vst [vmem:[#allocation11_spill] sm:$0xff] %v3846_v32  ;;  %v1215_v45 = vand.u32 2147483647, %v3087_v16 }
 0x2c0   :  { %v1200_v23 = vadd.f32 1.0, %v3089_v19  ;;  %3098 = vpow2.f32 %v1150_v17  ;;  %v3842_v28 = vpop.f32.mrb[43].mxu1  ;;  %v1203_v34 = vmul.f32 -0.5, %v3089_v19  ;;  %v1206_v46 = vand.u32 2147483647, %v3089_v19 }
 0x2c1   :  { %3100 = vlog2.f32 %v1209_v20  ;;  %v1148_v48 = vmul.f32 1.442695, %v1110_v27  ;;  %v1213_v51 = vadd.f32 1.0, %v1212_v30  ;;  %v1113_v52 = vsub.f32 0.0, %v1081_v31 }
 0x2c2   :  { %v3091_v29 = vpop.eup %3090  ;;  %3102 = vlog2.f32 %v1200_v23  ;;  %v1080_v53 = vand.u32 2147483647, %v3846_v32  ;;  %v1204_v55 = vadd.f32 1.0, %v1203_v34  ;;  %vm3873_vm1 = vcmp.lt.f32.partialorder %v1215_v45, 0.0004427343 }
 0x2c3   :  { %v3848_v33 = vpop.eup %3092  ;;  %v1227_v35 = vadd.f32 1.0, %v3091_v29  ;;  %v3852_v38 = vpop.f32.mrb[44].mxu1  ;;  %v1230_v39 = vmul.f32 -0.5, %v3091_v29  ;;  %v1233_v56 = vand.u32 2147483647, %v3091_v29  ;;  %v3885_v13 = vadd.f32 %v2876_v24, %v3801_v1 }
 0x2c4   :  { %v1218_v40 = vadd.f32 1.0, %v3848_v33  ;;  %v3857_v44 = vpop.f32.mrb[45].mxu1  ;;  %v1221_v58 = vmul.f32 -0.5, %v3848_v33  ;;  %v1224_v63 = vand.u32 2147483647, %v3848_v33  ;;  %v1112_v9 = vsub.f32 0.0, %v1080_v53 }
 0x2c5   :  { %3104 = vlog2.f32 %v1227_v35  ;;  %v1231_v62 = vadd.f32 1.0, %v1230_v39  ;;  %vm3877_vm2 = vcmp.lt.f32.partialorder %v1206_v46, 0.0004427343  ;;  %v1154_v11 = vmul.f32 1.442695, %v1113_v52  ;;  %5034 = vst [vmem:[#allocation12_spill] sm:$0xff] %v3885_v13 }
 0x2c6   :  { %v3859_v49 = vpop.eup %3094  ;;  %3106 = vlog2.f32 %v1218_v40  ;;  %v1214_v15 = vmul.f32 %v3087_v16, %v1213_v51  ;;  %v1205_v17 = vmul.f32 %v3089_v19, %v1204_v55  ;;  %v1222_v20 = vadd.f32 1.0, %v1221_v58 }
 0x2c7   :  { %v3862_v54 = vpop.eup %3096  ;;  %v1245_v59 = vadd.f32 1.0, %v3859_v49  ;;  %v3866_v61 = vpop.f32.mrb[46].mxu1  ;;  %v3890_v34 = vmul.f32 %v3091_v29, %v1231_v62  ;;  %vm3892_vm3 = vcmp.lt.f32.partialorder %v1233_v56, 0.0004427343  ;;  %vm3896_vm4 = vcmp.lt.f32.partialorder %v1224_v63, 0.0004427343 }
 0x2c8   :  { %v1236_v0 = vadd.f32 1.0, %v3862_v54  ;;  %v3871_v3 = vpop.f32.mrb[47].mxu1  ;;  %v1152_v16 = vmul.f32 1.442695, %v1112_v9  ;;  %v1248_v40 = vmul.f32 -0.5, %v3859_v49  ;;  %v1239_v46 = vmul.f32 -0.5, %v3862_v54 }
 0x2c9   :  { %3108 = vlog2.f32 %v1245_v59  ;;  %v1251_v45 = vand.u32 2147483647, %v3859_v49  ;;  %v1083_v51 = vand.u32 2147483647, %v3885_v13  ;;  %v1242_v62 = vand.u32 2147483647, %v3862_v54 }
 0x2ca   :  { %v3881_v10 = vpop.eup %3098  ;;  %3110 = vlog2.f32 %v1236_v0  ;;  %v1249_v9 = vadd.f32 1.0, %v1248_v40 }
 0x2cb   :  { %v3101_v14 = vpop.eup %3100  ;;  %v1263_v23 = vadd.f32 1.0, %v3881_v10  ;;  %v3888_v27 = vpop.f32.mrb[48].mxu1  ;;  %3112 = vpow2.f32 %v1148_v48  ;;  %v1266_v55 = vmul.f32 -0.5, %v3881_v10  ;;  %v1115_v63 = vsub.f32 0.0, %v1083_v51 }
 0x2cc   :  { %v3103_v30 = vpop.eup %3102  ;;  %v1211_v31 = vmul.f32 0.6931472, %v3101_v14  ;;  %v3900_v19 = vpop.f32.mrb[49].mxu1  ;;  %vm3935_vm5 = vcmp.lt.f32.partialorder %v1251_v45, 0.0004427343 }
 0x2cd   :  { %v1202_v24 = vmul.f32 0.6931472, %v3103_v30  ;;  %3114 = vlog2.f32 %v1263_v23  ;;  %v1158_v14 = vmul.f32 1.442695, %v1115_v63  ;;  %v1267_v23 = vadd.f32 1.0, %v1266_v55 }
 0x2ce   :  { %v1217_v29 = vsel %vm3873_vm1, %v1214_v15, %v1211_v31  ;;  %3116 = vpow2.f32 %v1154_v11  ;;  %v1240_v11 = vadd.f32 1.0, %v1239_v46  ;;  %vm3942_vm6 = vcmp.lt.f32.partialorder %v1242_v62, 0.0004427343 }
 0x2cf   :  { %v3105_v52 = vpop.eup %3104  ;;  %v3910_v48 = vadd.f32 %v1217_v29, %v1041_v21  ;;  %v1208_v53 = vsel %vm3877_vm2, %v1205_v17, %v1202_v24  ;;  %3118 = vpow2.f32 %v1152_v16  ;;  %v3915_v56 = vpop.f32.mrb[50].mxu1  ;;  %v3924_v21 = vadd.f32 %v3801_v1, %v3842_v28 }
 0x2d0   :  { %v3107_v58 = vpop.eup %3106  ;;  %v3919_v59 = vadd.f32 %v1208_v53, %v1040_v22  ;;  %v3926_v0 = vpop.f32.mrb[51].mxu1  ;;  %v1229_v6 = vmul.f32 0.6931472, %v3105_v52  ;;  %v3932_v22 = vadd.f32 %v3852_v38, %v3801_v1  ;;  %v1223_v17 = vmul.f32 %v3848_v33, %v1222_v20 }
 0x2d1   :  { %5039 = vst [vmem:[#allocation13_spill] sm:$0xff] %v3910_v48  ;;  %5041 = vst [vmem:[#allocation15_spill] sm:$0xff] %v3924_v21  ;;  %v1220_v7 = vmul.f32 0.6931472, %v3107_v58  ;;  %3120 = vlog2.f32 %v3910_v48  ;;  %v1082_v30 = vand.u32 2147483647, %v3924_v21  ;;  %v3949_v33 = vadd.f32 %v3801_v1, %v3857_v44 }
 0x2d2   :  { %5040 = vst [vmem:[#allocation14_spill] sm:$0xff] %v3919_v59  ;;  %3122 = vlog2.f32 %v3919_v59  ;;  %5042 = vst [vmem:[#allocation16_spill] sm:$0xff] %v3932_v22  ;;  %v1269_v38 = vand.u32 2147483647, %v3881_v10  ;;  %v1235_v40 = vsel %vm3892_vm3, %v3890_v34, %v1229_v6  ;;  %v1250_v52 = vmul.f32 %v3859_v49, %v1249_v9 }
 0x2d3   :  { %v3109_v15 = vpop.eup %3108  ;;  %v3940_v31 = vpop.f32.mrb[52].mxu1  ;;  %3124 = vpow2.f32 %v1158_v14  ;;  %5047 = vst [vmem:[#allocation17_spill] sm:$0xff] %v3949_v33  ;;  %v1226_v45 = vsel %vm3896_vm4, %v1223_v17, %v1220_v7  ;;  %v1114_v46 = vsub.f32 0.0, %v1082_v30  ;;  %v1241_v53 = vmul.f32 %v3862_v54, %v1240_v11 }
 0x2d4   :  { %v3111_v16 = vpop.eup %3110  ;;  %v3951_v20 = vpop.f32.mrb[53].mxu1  ;;  %v1247_v29 = vmul.f32 0.6931472, %v3109_v15  ;;  %v1085_v55 = vand.u32 2147483647, %v3932_v22  ;;  %v3965_v35 = vmul.f32 %v3881_v10, %v1267_v23  ;;  %v3975_v49 = vadd.f32 %v1235_v40, %v1043_v25 }
 0x2d5   :  { %v3958_v51 = vpop.eup %3112  ;;  %v1238_v62 = vmul.f32 0.6931472, %v3111_v16  ;;  %v3979_v54 = vadd.f32 %v1226_v45, %v1042_v26  ;;  %vm3981_vm7 = vcmp.lt.f32.partialorder %v1269_v38, 0.0004427343  ;;  %v2065_v15 = vpop.permute.xlu1 %2064  ;;  %v1156_v17 = vmul.f32 1.442695, %v1114_v46 }
 0x2d6   :  { %v1254_v34 = vadd.f32 1.0, %v3958_v51  ;;  %5048 = vst [vmem:[#allocation18_spill] sm:$0xff] %v3975_v49  ;;  %v1253_v14 = vsel %vm3935_vm5, %v1250_v52, %v1247_v29  ;;  %v1257_v23 = vmul.f32 -0.5, %v3958_v51  ;;  %v1117_v16 = vsub.f32 0.0, %v1085_v55 }
 0x2d7   :  { %v3115_v58 = vpop.eup %3114  ;;  %v3969_v63 = vpop.f32.mrb[54].mxu1  ;;  %5049 = vst [vmem:[#allocation19_spill] sm:$0xff] %v3979_v54  ;;  %v1084_v38 = vand.u32 2147483647, %v3949_v33  ;;  %v1244_v45 = vsel %vm3942_vm6, %v1241_v53, %v1238_v62  ;;  %v4001_v28 = vadd.f32 %v3866_v61, %v3801_v1  ;;  %v4005_v29 = vadd.f32 %v3801_v1, %v3871_v3 }
 0x2d8   :  { %v3971_v6 = vpop.eup %3116  ;;  %3126 = vlog2.f32 %v1254_v34  ;;  %v3992_v26 = vpop.f32.mrb[55].mxu1  ;;  %v4011_v55 = vadd.f32 %v1253_v14, %v1045_v36  ;;  %v1265_v34 = vmul.f32 0.6931472, %v3115_v58  ;;  %v1260_v24 = vand.u32 2147483647, %v3958_v51 }
 0x2d9   :  { %v3987_v11 = vpop.eup %3118  ;;  %v1281_v25 = vadd.f32 1.0, %v3971_v6  ;;  %5052 = vst [vmem:[#allocation20_spill] sm:$0xff] %v4001_v28  ;;  %5053 = vst [vmem:[#allocation21_spill] sm:$0xff] %v4005_v29  ;;  %v1284_v61 = vmul.f32 -0.5, %v3971_v6  ;;  %v4021_v9 = vadd.f32 %v1244_v45, %v1044_v37  ;;  %v1258_v10 = vadd.f32 1.0, %v1257_v23  ;;  %v4023_v36 = vpop.permute.xlu0 %2096 }
 0x2da   :  { %v1272_v30 = vadd.f32 1.0, %v3987_v11  ;;  %5054 = vst [vmem:[#allocation22_spill] sm:$0xff] %v4011_v55  ;;  %v1162_v58 = vmul.f32 1.442695, %v1117_v16  ;;  %v1116_v14 = vsub.f32 0.0, %v1084_v38  ;;  %v1275_v39 = vmul.f32 -0.5, %v3987_v11 }
 0x2db   :  { %v3121_v40 = vpop.eup %3120  ;;  %3128 = vlog2.f32 %v1281_v25  ;;  %v4007_v46 = vpop.f32.mrb[56].mxu1  ;;  %5055 = vst [vmem:[#allocation23_spill] sm:$0xff] %v4021_v9  ;;  %v1278_v12 = vand.u32 2147483647, %v3987_v11  ;;  %v1271_v16 = vsel %vm3981_vm7, %v3965_v35, %v1265_v34  ;;  %vm4036_vm8 = vcmp.lt.f32.partialorder %v1260_v24, 0.0004427343 }
 0x2dc   :  { %v3123_v52 = vpop.eup %3122  ;;  %3130 = vlog2.f32 %v1272_v30  ;;  %v4014_v53 = vpop.f32.mrb[57].mxu1  ;;  %v1907_v25 = vmul.f32 0.6931472, %v3121_v40  ;;  %v1287_v30 = vand.u32 2147483647, %v3971_v6  ;;  %v4050_v35 = vadd.f32 %v3888_v27, %v3801_v1 }
 0x2dd   :  { %v1905_v62 = vmul.f32 0.6931472, %v3123_v52  ;;  %3132 = vpow2.f32 %v1156_v17  ;;  %v4017_v3 = vpop.eup %3124  ;;  %v2067_v17 = vpop.permute.xlu1 %2066  ;;  %v1160_v37 = vmul.f32 1.442695, %v1116_v14  ;;  %v1086_v7 = vand.u32 2147483647, %v4005_v29 }
 0x2de   :  { %v1299_v52 = vadd.f32 1.0, %v4017_v3  ;;  %v2161_v2 = vadd.f32 %v2067_v17, %v1907_v25  ;;  %3134 = vpow2.f32 %v1162_v58  ;;  %v1302_v45 = vmul.f32 -0.5, %v4017_v3  ;;  %5060 = vst [vmem:[#allocation24_spill] sm:$0xff] %v4050_v35 }
 0x2df   :  { %v2160_v44 = vadd.f32 %v2065_v15, %v1905_v62  ;;  %v4028_v40 = vpop.f32.mrb[58].mxu1  ;;  %v1285_v15 = vadd.f32 1.0, %v1284_v61  ;;  %v1087_v25 = vand.u32 2147483647, %v4001_v28  ;;  %vm4042_vm9 = vcmp.lt.f32.partialorder %v1287_v30, 0.0004427343 }
 0x2e0   :  { %v4031_v23 = vpop.f32.mrb[59].mxu1  ;;  %3136 = vlog2.f32 %v1299_v52  ;;  %v1276_v24 = vadd.f32 1.0, %v1275_v39  ;;  %vm4054_vm10 = vcmp.lt.f32.partialorder %v1278_v12, 0.0004427343  ;;  %v4066_v27 = vadd.f32 %v1271_v16, %v1047_v4 }
 0x2e1   :  { %v3011_v62 = vpack.i.bf16 %v2161_v2, %v2160_v44  ;;  %3138 = vpow2.f32 %v1160_v37  ;;  %v4058_v44 = vpop.permute.xlu0 %2098  ;;  %v1119_v61 = vsub.f32 0.0, %v1087_v25  ;;  %v1305_v12 = vand.u32 2147483647, %v4017_v3 }
 0x2e2   :  { %v3127_v58 = vpop.eup %3126  ;;  %3140 = vlog2.f32 %v3975_v49  ;;  %v1118_v39 = vsub.f32 0.0, %v1086_v7  ;;  %v1089_v17 = vand.u32 2147483647, %v4050_v35  ;;  %v1259_v25 = vmul.f32 %v3958_v51, %v1258_v10  ;;  %v4081_v51 = vpop.permute.xlu1 %2102 }
 0x2e3   :  { %v4052_v34 = vpop.f32.mrb[60].mxu1  ;;  %3142 = vlog2.f32 %v3979_v54  ;;  %3012 = vrot.lane.b32.xlu1 %v3011_v62, %s3312_s28  ;;  %v1256_v43 = vmul.f32 0.6931472, %v3127_v58  ;;  %v1303_v60 = vadd.f32 1.0, %v1302_v45  ;;  %v1166_v50 = vmul.f32 1.442695, %v1119_v61 }
 0x2e4   :  { %v4062_v30 = vpop.f32.mrb[61].mxu1  ;;  %v1286_v57 = vmul.f32 %v3971_v6, %v1285_v15  ;;  %v1164_v47 = vmul.f32 1.442695, %v1118_v39  ;;  %v1121_v41 = vsub.f32 0.0, %v1089_v17  ;;  %v1277_v16 = vmul.f32 %v3987_v11, %v1276_v24 }
 0x2e5   :  { %v3129_v52 = vpop.eup %3128  ;;  %v4077_v54 = vadd.f32 %v3801_v1, %v3900_v19  ;;  %3144 = vpow2.f32 %v1166_v50  ;;  %v1262_v11 = vsel %vm4036_vm8, %v1259_v25, %v1256_v43  ;;  %v4090_v24 = vmul.f32 %v4017_v3, %v1303_v60  ;;  %v4092_v61 = vpop.permute.xlu0 %2100 }
 0x2e6   :  { %v3131_v37 = vpop.eup %3130  ;;  %v1283_v62 = vmul.f32 0.6931472, %v3129_v52  ;;  %v1170_v15 = vmul.f32 1.442695, %v1121_v41  ;;  %vm4096_vm11 = vcmp.lt.f32.partialorder %v1305_v12, 0.0004427343  ;;  %v4231_v48 = vadd.f32 %v3801_v1, %v3992_v26 }
 0x2e7   :  { %v3133_v42 = vpop.eup %3132  ;;  %v4072_v5 = vpop.f32.mrb[62].mxu1  ;;  %v1274_v4 = vmul.f32 0.6931472, %v3131_v37  ;;  %5063 = vst [vmem:[#allocation25_spill] sm:$0xff] %v4077_v54  ;;  %v1088_v3 = vand.u32 2147483647, %v4077_v54 }
 0x2e8   :  { %v1290_v7 = vadd.f32 1.0, %v3133_v42  ;;  %v4079_v58 = vpop.f32.mrb[63].mxu1  ;;  %v4085_v45 = vpop.eup %3134  ;;  %v1293_v19 = vmul.f32 -0.5, %v3133_v42  ;;  %v1289_v39 = vsel %vm4042_vm9, %v1286_v57, %v1283_v62  ;;  %v4109_v57 = vadd.f32 %v3915_v56, %v3801_v1  ;;  %5090 = vst [vmem:[#allocation31_spill] sm:$0xff] %v4231_v48 }
 0x2e9   :  { %v1317_v41 = vadd.f32 1.0, %v4085_v45  ;;  %v1280_v60 = vsel %vm4054_vm10, %v1277_v16, %v1274_v4  ;;  %v5067_v12 = vmax.f32 %v3831_v8, 0.0  ;;  %v5068_v2 = vmax.f32 %v3836_v18, 0.0  ;;  %v2069_v43 = vpop.permute.xlu0 %2068 }
 0x2ea   :  { %3146 = vlog2.f32 %v1290_v7  ;;  %v3137_v52 = vpop.eup %3136  ;;  %5066 = vst [vmem:[#allocation26_spill] sm:$0xff] %v4109_v57  ;;  %v1294_v4 = vadd.f32 1.0, %v1293_v19  ;;  %v1296_v16 = vand.u32 2147483647, %v3133_v42  ;;  %v5069_v56 = vmax.f32 %v3846_v32, 0.0 }
 0x2eb   :  { %3148 = vpow2.f32 %v1164_v47  ;;  %v4102_v38 = vpop.eup %3138  ;;  %v4113_v17 = vadd.f32 %v1262_v11, %v5067_v12  ;;  %v4119_v62 = vadd.f32 %v1289_v39, %v5068_v2  ;;  %v1320_v11 = vmul.f32 -0.5, %v4085_v45 }
 0x2ec   :  { %3150 = vpow2.f32 %v1170_v15  ;;  %v3141_v14 = vpop.eup %3140  ;;  %v1308_v47 = vadd.f32 1.0, %v4102_v38  ;;  %v4123_v15 = vadd.f32 %v1280_v60, %v5069_v56  ;;  %v1301_v6 = vmul.f32 0.6931472, %v3137_v52 }
 0x2ed   :  { %3152 = vlog2.f32 %v1317_v41  ;;  %v3143_v25 = vpop.eup %3142  ;;  %v1911_v7 = vmul.f32 0.6931472, %v3141_v14  ;;  %v2071_v41 = vpop.permute.xlu1 %2070  ;;  %v1323_v37 = vand.u32 2147483647, %v4085_v45  ;;  %v1120_v8 = vsub.f32 0.0, %v1088_v3 }
 0x2ee   :  { %5070 = vst [vmem:[#allocation27_spill] sm:$0xff] %v4123_v15  ;;  %3154 = vlog2.f32 %v1308_v47  ;;  %v1909_v12 = vmul.f32 0.6931472, %v3143_v25  ;;  %v1311_v39 = vmul.f32 -0.5, %v4102_v38  ;;  %v1091_v14 = vand.u32 2147483647, %v4109_v57 }
 0x2ef   :  { %v2163_v10 = vadd.f32 %v2071_v41, %v1911_v7  ;;  %v4131_v60 = vadd.f32 %v3801_v1, %v3926_v0  ;;  %v1295_v2 = vmul.f32 %v3133_v42, %v1294_v4  ;;  %vm4133_vm12 = vcmp.lt.f32.partialorder %v1296_v16, 0.0004427343  ;;  %v4138_v25 = vpop.eup %3144 }
 0x2f0   :  { %v2162_v19 = vadd.f32 %v2069_v43, %v1909_v12  ;;  %v1168_v52 = vmul.f32 1.442695, %v1120_v8  ;;  %3156 = vlog2.f32 %v4011_v55  ;;  %v1321_v3 = vadd.f32 1.0, %v1320_v11 }
 0x2f1   :  { %5071 = vst [vmem:[#allocation28_spill] sm:$0xff] %v4131_v60  ;;  %v1123_v56 = vsub.f32 0.0, %v1091_v14  ;;  %v1090_v43 = vand.u32 2147483647, %v4131_v60  ;;  %v1307_v0 = vsel %vm4096_vm11, %v4090_v24, %v1301_v6  ;;  %v1314_v42 = vand.u32 2147483647, %v4102_v38 }
 0x2f2   :  { %v3021_v7 = vpack.i.bf16 %v2163_v10, %v2162_v19  ;;  %v1335_v4 = vadd.f32 1.0, %v4138_v25  ;;  %3158 = vpow2.f32 %v1168_v52  ;;  %vm4146_vm13 = vcmp.lt.f32.partialorder %v1323_v37, 0.0004427343 }
 0x2f3   :  { %v1312_v10 = vadd.f32 1.0, %v1311_v39  ;;  %3160 = vlog2.f32 %v4021_v9  ;;  %v1338_v6 = vmul.f32 -0.5, %v4138_v25  ;;  %v1174_v50 = vmul.f32 1.442695, %v1123_v56 }
 0x2f4   :  { %v3147_v41 = vpop.eup %3146  ;;  %3022 = vrot.lane.b32.xlu1 %v3021_v7, %s3312_s28  ;;  %3162 = vlog2.f32 %v1335_v4  ;;  %v5076_v14 = vmax.f32 %v3885_v13, 0.0  ;;  %v1322_v37 = vmul.f32 %v4085_v45, %v1321_v3  ;;  %vm4161_vm14 = vcmp.lt.f32.partialorder %v1314_v42, 0.0004427343  ;;  %v4171_v45 = vpop.permute.xlu1 %2106 }
 0x2f5   :  { %v3149_v8 = vpop.eup %3148  ;;  %v1292_v16 = vmul.f32 0.6931472, %v3147_v41  ;;  %v1122_v41 = vsub.f32 0.0, %v1090_v43  ;;  %v4167_v4 = vadd.f32 %v3940_v31, %v3801_v1  ;;  %v1313_v43 = vmul.f32 %v4102_v38, %v1312_v10  ;;  %v4177_v13 = vpop.permute.xlu0 %2104 }
 0x2f6   :  { %v4152_v11 = vpop.eup %3150  ;;  %v1326_v24 = vadd.f32 1.0, %v3149_v8  ;;  %v4157_v52 = vadd.f32 %v1307_v0, %v5076_v14  ;;  %v1329_v14 = vmul.f32 -0.5, %v3149_v8  ;;  %v1339_v42 = vadd.f32 1.0, %v1338_v6 }
 0x2f7   :  { %v3153_v19 = vpop.eup %3152  ;;  %v1353_v39 = vadd.f32 1.0, %v4152_v11  ;;  %5079 = vst [vmem:[#allocation29_spill] sm:$0xff] %v4167_v4  ;;  %v1298_v0 = vsel %vm4133_vm12, %v1295_v2, %v1292_v16  ;;  %v1356_v31 = vmul.f32 -0.5, %v4152_v11  ;;  %v1172_v2 = vmul.f32 1.442695, %v1122_v41 }
 0x2f8   :  { %v1319_v32 = vmul.f32 0.6931472, %v3153_v19  ;;  %3164 = vlog2.f32 %v1326_v24  ;;  %v3155_v56 = vpop.eup %3154  ;;  %v1341_v19 = vand.u32 2147483647, %v4138_v25  ;;  %v1332_v10 = vand.u32 2147483647, %v3149_v8 }
 0x2f9   :  { %3166 = vlog2.f32 %v1353_v39  ;;  %v1310_v24 = vmul.f32 0.6931472, %v3155_v56  ;;  %v5080_v39 = vmax.f32 %v3924_v21, 0.0  ;;  %v1093_v6 = vand.u32 2147483647, %v4167_v4 }
 0x2fa   :  { %3168 = vpow2.f32 %v1174_v50  ;;  %v3157_v16 = vpop.eup %3156  ;;  %v1325_v38 = vsel %vm4146_vm13, %v1322_v37, %v1319_v32  ;;  %v1330_v50 = vadd.f32 1.0, %v1329_v14  ;;  %v1359_v56 = vand.u32 2147483647, %v4152_v11 }
 0x2fb   :  { %v4182_v18 = vadd.f32 %v1298_v0, %v5080_v39  ;;  %3170 = vpow2.f32 %v1172_v2  ;;  %v1915_v3 = vmul.f32 0.6931472, %v3157_v16  ;;  %v4189_v47 = vmul.f32 %v4138_v25, %v1339_v42 }
 0x2fc   :  { %v3159_v9 = vpop.eup %3158  ;;  %v1125_v41 = vsub.f32 0.0, %v1093_v6  ;;  %v4193_v0 = vadd.f32 %v3801_v1, %v3951_v20  ;;  %v4197_v32 = vadd.f32 %v3969_v63, %v3801_v1  ;;  %v5082_v37 = vmax.f32 %v3932_v22, 0.0  ;;  %v2075_v20 = vpop.permute.xlu1 %2074 }
 0x2fd   :  { %v3161_v12 = vpop.eup %3160  ;;  %v1316_v2 = vsel %vm4161_vm14, %v1313_v43, %v1310_v24  ;;  %vm4205_vm15 = vcmp.lt.f32.partialorder %v1341_v19, 0.0004427343  ;;  %v1357_v42 = vadd.f32 1.0, %v1356_v31  ;;  %v1344_v16 = vadd.f32 1.0, %v3159_v9  ;;  %v2073_v43 = vpop.permute.xlu0 %2072 }
 0x2fe   :  { %5081 = vst [vmem:[#allocation30_spill] sm:$0xff] %v4193_v0  ;;  %v4201_v14 = vadd.f32 %v1325_v38, %v5082_v37  ;;  %v3163_v39 = vpop.eup %3162  ;;  %v1347_v6 = vmul.f32 -0.5, %v3159_v9  ;;  %v2165_v21 = vadd.f32 %v2075_v20, %v1915_v3  ;;  %v1913_v63 = vmul.f32 0.6931472, %v3161_v12 }
 0x2ff   :  { %v1178_v59 = vmul.f32 1.442695, %v1125_v41  ;;  %v4209_v55 = vmul.f32 %v3149_v8, %v1330_v50  ;;  %vm4211_vm1 = vcmp.lt.f32.partialorder %v1332_v10, 0.0004427343  ;;  %vm4215_vm2 = vcmp.lt.f32.partialorder %v1359_v56, 0.0004427343 }
 0x300   :  { %3172 = vlog2.f32 %v1344_v16  ;;  %v2164_v31 = vadd.f32 %v2073_v43, %v1913_v63  ;;  %v1092_v3 = vand.u32 2147483647, %v4193_v0  ;;  %v1095_v8 = vand.u32 2147483647, %v4197_v32 }
 0x301   :  { %3174 = vpow2.f32 %v1178_v59  ;;  %v5089_v10 = vmax.f32 %v3949_v33, 0.0  ;;  %v1337_v56 = vmul.f32 0.6931472, %v3163_v39  ;;  %v1358_v12 = vmul.f32 %v4152_v11, %v1357_v42 }
 0x302   :  { %v3165_v24 = vpop.eup %3164  ;;  %v1350_v37 = vand.u32 2147483647, %v3159_v9  ;;  %v1348_v22 = vadd.f32 1.0, %v1347_v6  ;;  %v3031_v19 = vpack.i.bf16 %v2165_v21, %v2164_v31  ;;  %v1124_v49 = vsub.f32 0.0, %v1092_v3 }
 0x303   :  { %v3167_v50 = vpop.eup %3166  ;;  %v4224_v41 = vadd.f32 %v1316_v2, %v5089_v10  ;;  %v1328_v2 = vmul.f32 0.6931472, %v3165_v24  ;;  %v1127_v42 = vsub.f32 0.0, %v1095_v8  ;;  %v5091_v21 = vmax.f32 %v4050_v35, 0.0 }
 0x304   :  { %v3169_v16 = vpop.eup %3168  ;;  %v1355_v20 = vmul.f32 0.6931472, %v3167_v50  ;;  %v1176_v11 = vmul.f32 1.442695, %v1124_v49  ;;  %3032 = vrot.lane.b32.xlu1 %v3031_v19, %s3312_s28  ;;  %vm4240_vm3 = vcmp.lt.f32.partialorder %v1350_v37, 0.0004427343  ;;  %v1343_v7 = vsel %vm4205_vm15, %v4189_v47, %v1337_v56 }
 0x305   :  { %v1371_v63 = vadd.f32 1.0, %v3169_v16  ;;  %v3171_v6 = vpop.eup %3170  ;;  %v1374_v26 = vmul.f32 -0.5, %v3169_v16  ;;  %v1349_v24 = vmul.f32 %v3159_v9, %v1348_v22  ;;  %v1182_v8 = vmul.f32 1.442695, %v1127_v42 }
 0x306   :  { %v1361_v39 = vsel %vm4215_vm2, %v1358_v12, %v1355_v20  ;;  %v1362_v49 = vadd.f32 1.0, %v3171_v6  ;;  %v1365_v19 = vmul.f32 -0.5, %v3171_v6  ;;  %v1094_v50 = vand.u32 2147483647, %v4231_v48  ;;  %v4290_v12 = vpop.permute.xlu1 %2110 }
 0x307   :  { %v4238_v31 = vadd.f32 %v1361_v39, %v5091_v21  ;;  %3176 = vlog2.f32 %v1371_v63  ;;  %v1334_v10 = vsel %vm4211_vm1, %v4209_v55, %v1328_v2  ;;  %v4255_v25 = vadd.f32 %v4007_v46, %v3801_v1 }
 0x308   :  { %3178 = vpow2.f32 %v1176_v11  ;;  %v1375_v9 = vadd.f32 1.0, %v1374_v26  ;;  %v1377_v47 = vand.u32 2147483647, %v3169_v16  ;;  %v1126_v56 = vsub.f32 0.0, %v1094_v50 }
 0x309   :  { %3180 = vlog2.f32 %v4238_v31  ;;  %5094 = vst [vmem:[#allocation32_spill] sm:$0xff] %v4255_v25  ;;  %v1368_v63 = vand.u32 2147483647, %v3171_v6  ;;  %v4260_v55 = vadd.f32 %v3801_v1, %v4014_v53  ;;  %v1366_v38 = vadd.f32 1.0, %v1365_v19 }
 0x30a   :  { %3182 = vlog2.f32 %v1362_v49  ;;  %v3173_v22 = vpop.eup %3172  ;;  %v1180_v39 = vmul.f32 1.442695, %v1126_v56  ;;  %v4264_v46 = vadd.f32 %v4028_v40, %v3801_v1  ;;  %v5096_v11 = vmax.f32 %v4001_v28, 0.0 }
 0x30b   :  { %3184 = vpow2.f32 %v1182_v8  ;;  %v3175_v37 = vpop.eup %3174  ;;  %v1346_v20 = vmul.f32 0.6931472, %v3173_v22  ;;  %5095 = vst [vmem:[#allocation33_spill] sm:$0xff] %v4260_v55  ;;  %v5097_v21 = vmax.f32 %v4005_v29, 0.0  ;;  %v1097_v53 = vand.u32 2147483647, %v4255_v25 }
 0x30c   :  { %3186 = vlog2.f32 %v4066_v27  ;;  %v1389_v2 = vadd.f32 1.0, %v3175_v37  ;;  %v4268_v42 = vadd.f32 %v1343_v7, %v5096_v11  ;;  %vm4276_vm4 = vcmp.lt.f32.partialorder %v1377_v47, 0.0004427343 }
 0x30d   :  { %v4272_v26 = vadd.f32 %v1334_v10, %v5097_v21  ;;  %3188 = vlog2.f32 %v4113_v17  ;;  %v1392_v19 = vmul.f32 -0.5, %v3175_v37  ;;  %v1395_v40 = vand.u32 2147483647, %v3175_v37 }
 0x30e   :  { %3190 = vlog2.f32 %v1389_v2  ;;  %v1352_v8 = vsel %vm4240_vm3, %v1349_v24, %v1346_v20  ;;  %v1129_v7 = vsub.f32 0.0, %v1097_v53  ;;  %v1096_v50 = vand.u32 2147483647, %v4260_v55 }
 0x30f   :  { %3192 = vpow2.f32 %v1180_v39  ;;  %v1376_v22 = vmul.f32 %v3169_v16, %v1375_v9  ;;  %v1367_v56 = vmul.f32 %v3171_v6, %v1366_v38  ;;  %vm4283_vm5 = vcmp.lt.f32.partialorder %v1368_v63, 0.0004427343 }
 0x310   :  { %v1099_v47 = vand.u32 2147483647, %v4264_v46  ;;  %v1186_v24 = vmul.f32 1.442695, %v1129_v7  ;;  %v1128_v20 = vsub.f32 0.0, %v1096_v50  ;;  %v5102_v16 = vmax.f32 %v4077_v54, 0.0  ;;  %v4306_v7 = vpop.permute.xlu0 %2108 }
 0x311   :  { %v3177_v10 = vpop.eup %3176  ;;  %v1393_v9 = vadd.f32 1.0, %v1392_v19  ;;  %3194 = vlog2.f32 %v4119_v62  ;;  %vm4301_vm6 = vcmp.lt.f32.partialorder %v1395_v40, 0.0004427343  ;;  %v4317_v29 = vadd.f32 %v3801_v1, %v4031_v23 }
 0x312   :  { %v4288_v21 = vpop.eup %3178  ;;  %v1373_v2 = vmul.f32 0.6931472, %v3177_v10  ;;  %v4297_v6 = vadd.f32 %v1352_v8, %v5102_v16  ;;  %3196 = vpow2.f32 %v1186_v24  ;;  %v1184_v8 = vmul.f32 1.442695, %v1128_v20 }
 0x313   :  { %v4293_v39 = vpop.eup %3180  ;;  %v1380_v63 = vadd.f32 1.0, %v4288_v21  ;;  %v1383_v10 = vmul.f32 -0.5, %v4288_v21  ;;  %v1131_v16 = vsub.f32 0.0, %v1099_v47  ;;  %5106 = vst [vmem:[#allocation35_spill] sm:$0xff] %v4317_v29  ;;  %v1394_v24 = vmul.f32 %v3175_v37, %v1393_v9 }
 0x314   :  { %5103 = vst [vmem:[#allocation34_spill] sm:$0xff] %v4297_v6  ;;  %v3183_v38 = vpop.eup %3182  ;;  %v1379_v19 = vsel %vm4276_vm4, %v1376_v22, %v1373_v2  ;;  %v1386_v50 = vand.u32 2147483647, %v4288_v21  ;;  %v5107_v2 = vmax.f32 %v4109_v57, 0.0  ;;  %v2077_v57 = vpop.permute.xlu0 %2076 }
 0x315   :  { %v4309_v3 = vpop.eup %3184  ;;  %3198 = vlog2.f32 %v1380_v63  ;;  %v1364_v40 = vmul.f32 0.6931472, %v3183_v38  ;;  %v1384_v20 = vadd.f32 1.0, %v1383_v10  ;;  %v2079_v63 = vpop.permute.xlu1 %2078  ;;  %v1190_v33 = vmul.f32 1.442695, %v1131_v16 }
 0x316   :  { %v3187_v43 = vpop.eup %3186  ;;  %v1407_v59 = vadd.f32 1.0, %v4309_v3  ;;  %3200 = vlog2.f32 %v4297_v6  ;;  %v4323_v47 = vadd.f32 %v1379_v19, %v5107_v2  ;;  %v1410_v1 = vmul.f32 -0.5, %v4309_v3 }
 0x317   :  { %v1919_v49 = vmul.f32 0.6931472, %v3187_v43  ;;  %v3189_v22 = vpop.eup %3188  ;;  %v1370_v43 = vsel %vm4283_vm5, %v1367_v56, %v1364_v40  ;;  %v1098_v19 = vand.u32 2147483647, %v4317_v29  ;;  %vm4330_vm7 = vcmp.lt.f32.partialorder %v1386_v50, 0.0004427343 }
 0x318   :  { %5108 = vst [vmem:[#allocation36_spill] sm:$0xff] %v4323_v47  ;;  %3202 = vlog2.f32 %v1407_v59  ;;  %v3191_v54 = vpop.eup %3190  ;;  %v1917_v23 = vmul.f32 0.6931472, %v3189_v22  ;;  %v1413_v10 = vand.u32 2147483647, %v4309_v3 }
 0x319   :  { %3204 = vpow2.f32 %v1184_v8  ;;  %v3193_v37 = vpop.eup %3192  ;;  %v1391_v9 = vmul.f32 0.6931472, %v3191_v54  ;;  %v2167_v35 = vadd.f32 %v2079_v63, %v1919_v49  ;;  %v1130_v11 = vsub.f32 0.0, %v1098_v19  ;;  %v4344_v50 = vld [vmem:[%s4981_s6] ss:$0 sm:$0xff]  ;;  %v4350_v22 = vpop.permute.xlu1 %2114 }
 0x31a   :  { %v1398_v2 = vadd.f32 1.0, %v3193_v37  ;;  %v2166_v38 = vadd.f32 %v2077_v57, %v1917_v23  ;;  %v1401_v16 = vmul.f32 -0.5, %v3193_v37  ;;  %3206 = vpow2.f32 %v1190_v33 }
 0x31b   :  { %v1397_v8 = vsel %vm4301_vm6, %v1394_v24, %v1391_v9  ;;  %v3195_v56 = vpop.eup %3194  ;;  %v5111_v54 = vmax.f32 %v4131_v60, 0.0  ;;  %v1411_v49 = vadd.f32 1.0, %v1410_v1  ;;  %v4348_v57 = vadd.f32 %v4344_v50, %v4052_v34  ;;  %v4359_v60 = vpop.permute.xlu0 %2112  ;;  %vm4705_vm6 = vmpackc.low %vm354_vm0, %vm354_vm0 }
 0x31c   :  { %3208 = vlog2.f32 %v1398_v2  ;;  %v3197_v53 = vpop.eup %3196  ;;  %v1404_v24 = vand.u32 2147483647, %v3193_v37  ;;  %v3041_v33 = vpack.i.bf16 %v2167_v35, %v2166_v38  ;;  %v1188_v63 = vmul.f32 1.442695, %v1130_v11 }
 0x31d   :  { %v4339_v40 = vadd.f32 %v1370_v43, %v5111_v54  ;;  %3210 = vlog2.f32 %v4123_v15  ;;  %v5113_v1 = vmax.f32 %v4167_v4, 0.0  ;;  %v1385_v9 = vmul.f32 %v4288_v21, %v1384_v20 }
 0x31e   :  { %3212 = vlog2.f32 %v4323_v47  ;;  %v1425_v19 = vadd.f32 1.0, %v3197_v53  ;;  %v1402_v2 = vadd.f32 1.0, %v1401_v16  ;;  %v1428_v54 = vmul.f32 -0.5, %v3197_v53  ;;  %3042 = vrot.lane.b32.xlu1 %v3041_v33, %s3312_s28 }
 0x31f   :  { %5112 = vst [vmem:[#allocation37_spill] sm:$0xff] %v4339_v40  ;;  %v3199_v23 = vpop.eup %3198  ;;  %v4356_v43 = vadd.f32 %v1397_v8, %v5113_v1  ;;  %3214 = vpow2.f32 %v1188_v63  ;;  %vm4364_vm8 = vcmp.lt.f32.partialorder %v1413_v10, 0.0004427343  ;;  %v1923_v8 = vmul.f32 0.6931472, %v3195_v56 }
 0x320   :  { %v1382_v34 = vmul.f32 0.6931472, %v3199_v23  ;;  %v4362_v35 = vpop.eup %3200  ;;  %3216 = vlog2.f32 %v1425_v19  ;;  %v1101_v11 = vand.u32 2147483647, %v4348_v57  ;;  %v1412_v20 = vmul.f32 %v4309_v3, %v1411_v49  ;;  %v2083_v49 = vpop.permute.xlu1 %2082 }
 0x321   :  { %3218 = vlog2.f32 %v4339_v40  ;;  %vm4371_vm9 = vcmp.lt.f32.partialorder %v1404_v24, 0.0004427343  ;;  %v4377_v33 = vadd.f32 %v4344_v50, %v4062_v30  ;;  %v1431_v23 = vand.u32 2147483647, %v3197_v53 }
 0x322   :  { %v3203_v21 = vpop.eup %3202  ;;  %v1388_v63 = vsel %vm4330_vm7, %v1385_v9, %v1382_v34  ;;  %v1133_v1 = vsub.f32 0.0, %v1101_v11  ;;  %3220 = vlog2.f32 %v4356_v43  ;;  %v1403_v19 = vmul.f32 %v3193_v37, %v1402_v2  ;;  %v2081_v9 = vpop.permute.xlu0 %2080 }
 0x323   :  { %v3205_v10 = vpop.eup %3204  ;;  %v1409_v56 = vmul.f32 0.6931472, %v3203_v21  ;;  %v1429_v4 = vadd.f32 1.0, %v1428_v54  ;;  %v2169_v28 = vadd.f32 %v2083_v49, %v1923_v8  ;;  %v1100_v6 = vand.u32 2147483647, %v4377_v33 }
 0x324   :  { %v1416_v3 = vadd.f32 1.0, %v3205_v10  ;;  %v1419_v24 = vmul.f32 -0.5, %v3205_v10  ;;  %v1194_v40 = vmul.f32 1.442695, %v1133_v1  ;;  %v3207_v30 = vpop.eup %3206  ;;  %v5118_v15 = vmax.f32 %v4193_v0, 0.0 }
 0x325   :  { %v1415_v59 = vsel %vm4364_vm8, %v1412_v20, %v1409_v56  ;;  %v4391_v37 = vadd.f32 %v4344_v50, %v4072_v5  ;;  %vm4393_vm10 = vcmp.lt.f32.partialorder %v1431_v23, 0.0004427343  ;;  %v1422_v54 = vand.u32 2147483647, %v3205_v10 }
 0x326   :  { %v4385_v47 = vadd.f32 %v1388_v63, %v5118_v15  ;;  %3222 = vlog2.f32 %v1416_v3  ;;  %v3209_v34 = vpop.eup %3208  ;;  %v1443_v8 = vadd.f32 1.0, %v3207_v30  ;;  %v1430_v21 = vmul.f32 %v3197_v53, %v1429_v4 }
 0x327   :  { %3224 = vpow2.f32 %v1194_v40  ;;  %v3211_v11 = vpop.eup %3210  ;;  %v1400_v15 = vmul.f32 0.6931472, %v3209_v34  ;;  %v1446_v63 = vmul.f32 -0.5, %v3207_v30  ;;  %v1132_v38 = vsub.f32 0.0, %v1100_v6  ;;  %v4406_v34 = vpop.permute.xlu1 %2118 }
 0x328   :  { %v3213_v20 = vpop.eup %3212  ;;  %v5121_v56 = vmax.f32 %v4197_v32, 0.0  ;;  %v1420_v5 = vadd.f32 1.0, %v1419_v24  ;;  %3226 = vlog2.f32 %v1443_v8  ;;  %v1921_v3 = vmul.f32 0.6931472, %v3211_v11 }
 0x329   :  { %v4401_v23 = vpop.eup %3214  ;;  %3228 = vlog2.f32 %v4385_v47  ;;  %v1406_v40 = vsel %vm4371_vm9, %v1403_v19, %v1400_v15  ;;  %v1192_v49 = vmul.f32 1.442695, %v1132_v38  ;;  %v1103_v4 = vand.u32 2147483647, %v4391_v37  ;;  %v4418_v38 = vpop.permute.xlu0 %2116 }
 0x32a   :  { %v4399_v1 = vadd.f32 %v1415_v59, %v5121_v56  ;;  %v3217_v6 = vpop.eup %3216  ;;  %v5122_v53 = vmax.f32 %v4231_v48, 0.0  ;;  %vm4413_vm11 = vcmp.lt.f32.partialorder %v1422_v54, 0.0004427343  ;;  %v1449_v8 = vand.u32 2147483647, %v3207_v30 }
 0x32b   :  { %v1434_v11 = vadd.f32 1.0, %v4401_v23  ;;  %v3219_v56 = vpop.eup %3218  ;;  %v1427_v16 = vmul.f32 0.6931472, %v3217_v6  ;;  %v1447_v19 = vadd.f32 1.0, %v1446_v63  ;;  %v2168_v15 = vadd.f32 %v2081_v9, %v1921_v3 }
 0x32c   :  { %v4411_v59 = vadd.f32 %v1406_v40, %v5122_v53  ;;  %3230 = vpow2.f32 %v1192_v49  ;;  %v1421_v0 = vmul.f32 %v3205_v10, %v1420_v5  ;;  %v1135_v48 = vsub.f32 0.0, %v1103_v4  ;;  %v4425_v40 = vpop.eup %3220 }
 0x32d   :  { %3232 = vlog2.f32 %v4399_v1  ;;  %v4423_v54 = vadd.f32 %v4344_v50, %v4079_v58  ;;  %v1433_v53 = vsel %vm4393_vm10, %v1430_v21, %v1427_v16  ;;  %v1437_v63 = vmul.f32 -0.5, %v4401_v23  ;;  %v4440_v21 = vpop.permute.xlu1 %2086  ;;  %v4451_v16 = vpop.permute.xlu0 %2084 }
 0x32e   :  { %3234 = vlog2.f32 %v1434_v11  ;;  %v3051_v9 = vpack.i.bf16 %v2169_v28, %v2168_v15  ;;  %v5125_v3 = vmax.f32 %v4255_v25, 0.0  ;;  %vm4435_vm12 = vcmp.lt.f32.partialorder %v1449_v8, 0.0004427343 }
 0x32f   :  { %3236 = vlog2.f32 %v4411_v59  ;;  %v1198_v58 = vmul.f32 1.442695, %v1135_v48  ;;  %v1448_v5 = vmul.f32 %v3207_v30, %v1447_v19  ;;  %v1102_v2 = vand.u32 2147483647, %v4423_v54 }
 0x330   :  { %v4433_v49 = vadd.f32 %v1433_v53, %v5125_v3  ;;  %v3223_v50 = vpop.eup %3222  ;;  %3238 = vlog2.f32 %v4157_v52  ;;  %3052 = vrot.lane.b32.xlu1 %v3051_v9, %s3312_s28  ;;  %v1937_v28 = vmul.f32 0.6931472, %v4362_v35  ;;  %v1440_v8 = vand.u32 2147483647, %v4401_v23 }
 0x331   :  { %v4445_v4 = vpop.eup %3224  ;;  %v1418_v6 = vmul.f32 0.6931472, %v3223_v50  ;;  %v1939_v48 = vmul.f32 0.6931472, %v4293_v39  ;;  %v1438_v30 = vadd.f32 1.0, %v1437_v63  ;;  %v1134_v53 = vsub.f32 0.0, %v1102_v2 }
 0x332   :  { %3240 = vlog2.f32 %v4433_v49  ;;  %v1461_v11 = vadd.f32 1.0, %v4445_v4  ;;  %v1941_v19 = vmul.f32 0.6931472, %v3219_v56  ;;  %v3227_v15 = vpop.eup %3226  ;;  %v1943_v9 = vmul.f32 0.6931472, %v3213_v20 }
 0x333   :  { %3242 = vpow2.f32 %v1198_v58  ;;  %v1424_v35 = vsel %vm4413_vm11, %v1421_v0, %v1418_v6  ;;  %v3229_v3 = vpop.eup %3228  ;;  %v5128_v50 = vmax.f32 %v4260_v55, 0.0  ;;  %v1445_v39 = vmul.f32 0.6931472, %v3227_v15  ;;  %v4473_v6 = vpop.permute.xlu1 %2122 }
 0x334   :  { %3244 = vlog2.f32 %v4182_v18  ;;  %v2176_v63 = vadd.f32 %v4023_v36, %v1937_v28  ;;  %v1464_v58 = vmul.f32 -0.5, %v4445_v4  ;;  %v1196_v56 = vmul.f32 1.442695, %v1134_v53 }
 0x335   :  { %v4458_v25 = vadd.f32 %v1424_v35, %v5128_v50  ;;  %3246 = vlog2.f32 %v1461_v11  ;;  %v2177_v0 = vadd.f32 %v4058_v44, %v1939_v48  ;;  %v1451_v20 = vsel %vm4435_vm12, %v1448_v5, %v1445_v39 }
 0x336   :  { %3248 = vlog2.f32 %v4201_v14  ;;  %v4464_v24 = vpop.eup %3230  ;;  %vm4469_vm13 = vcmp.lt.f32.partialorder %v1440_v8, 0.0004427343  ;;  %v2178_v36 = vadd.f32 %v4092_v61, %v1941_v19  ;;  %v5131_v11 = vmax.f32 %v4264_v46, 0.0  ;;  %v4483_v8 = vpop.permute.xlu0 %2120 }
 0x337   :  { %3250 = vlog2.f32 %v4458_v25  ;;  %v3233_v28 = vpop.eup %3232  ;;  %v1439_v44 = vmul.f32 %v4401_v23, %v1438_v30  ;;  %v1467_v48 = vand.u32 2147483647, %v4445_v4  ;;  %v1452_v10 = vadd.f32 1.0, %v4464_v24 }
 0x338   :  { %v4478_v15 = vadd.f32 %v1451_v20, %v5131_v11  ;;  %v3235_v5 = vpop.eup %3234  ;;  %3252 = vpow2.f32 %v1196_v56  ;;  %v3006_v35 = vpack.i.bf16 %v2177_v0, %v2176_v63  ;;  %v2179_v53 = vadd.f32 %v4081_v51, %v1943_v9 }
 0x339   :  { %v1945_v50 = vmul.f32 0.6931472, %v3229_v3  ;;  %v3237_v61 = vpop.eup %3236  ;;  %v1436_v19 = vmul.f32 0.6931472, %v3235_v5  ;;  %v1465_v39 = vadd.f32 1.0, %v1464_v58  ;;  %3254 = vlog2.f32 %v1452_v10 }
 0x33a   :  { %v1455_v20 = vmul.f32 -0.5, %v4464_v24  ;;  %v3239_v11 = vpop.eup %3238  ;;  %3256 = vlog2.f32 %v4478_v15  ;;  %3007 = vrot.lane.b32.xlu0 %v3006_v35, %s3312_s28  ;;  %v3016_v23 = vpack.i.bf16 %v2179_v53, %v2178_v36  ;;  %v1947_v30 = vmul.f32 0.6931472, %v4425_v40 }
 0x33b   :  { %v2180_v56 = vadd.f32 %v4177_v13, %v1945_v50  ;;  %v1442_v51 = vsel %vm4469_vm13, %v1439_v44, %v1436_v19  ;;  %v1069_v9 = vmax.f32 %v4348_v57, 0.0  ;;  %v1927_v3 = vmul.f32 0.6931472, %v3239_v11  ;;  %v2091_v13 = vpop.permute.xlu1 %2090  ;;  %v2089_v11 = vpop.permute.xlu0 %2088 }
 0x33c   :  { %v3241_v63 = vpop.eup %3240  ;;  %3258 = vlog2.f32 %v4224_v41  ;;  %v5132_v0 = vmax.f32 %v4317_v29, 0.0  ;;  %vm4501_vm14 = vcmp.lt.f32.partialorder %v1467_v48, 0.0004427343  ;;  %v2181_v40 = vadd.f32 %v4171_v45, %v1947_v30 }
 0x33d   :  { %v4495_v58 = vpop.eup %3242  ;;  %3260 = vlog2.f32 %v4268_v42  ;;  %v1466_v44 = vmul.f32 %v4445_v4, %v1465_v39  ;;  %v1456_v5 = vadd.f32 1.0, %v1455_v20  ;;  %v1458_v35 = vand.u32 2147483647, %v4464_v24 }
 0x33e   :  { %v4499_v10 = vadd.f32 %v1442_v51, %v5132_v0  ;;  %v3245_v2 = vpop.eup %3244  ;;  %v1479_v53 = vadd.f32 1.0, %v4495_v58  ;;  %v2171_v48 = vadd.f32 %v4440_v21, %v1927_v3  ;;  %3017 = vrot.lane.b32.xlu0 %v3016_v23, %s3312_s28  ;;  %v3026_v51 = vpack.i.bf16 %v2181_v40, %v2180_v56 }
 0x33f   :  { %v3247_v50 = vpop.eup %3246  ;;  %v1925_v19 = vmul.f32 0.6931472, %v3245_v2  ;;  %v1955_v45 = vmul.f32 0.6931472, %v3241_v63  ;;  %v1482_v4 = vmul.f32 -0.5, %v4495_v58  ;;  %v1068_v20 = vmax.f32 %v4377_v33, 0.0 }
 0x340   :  { %3262 = vlog2.f32 %v4499_v10  ;;  %v3249_v0 = vpop.eup %3248  ;;  %v1463_v30 = vmul.f32 0.6931472, %v3247_v50  ;;  %v1949_v55 = vmul.f32 0.6931472, %v3237_v61  ;;  %v1951_v56 = vmul.f32 0.6931472, %v3233_v28  ;;  %v4522_v50 = vpop.permute.xlu1 %2126 }
 0x341   :  { %3264 = vlog2.f32 %v1479_v53  ;;  %v3251_v39 = vpop.eup %3250  ;;  %v2170_v29 = vadd.f32 %v4451_v16, %v1925_v19  ;;  %v1931_v23 = vmul.f32 0.6931472, %v3249_v0  ;;  %v1457_v2 = vmul.f32 %v4464_v24, %v1456_v5 }
 0x342   :  { %3266 = vlog2.f32 %v4272_v26  ;;  %v1953_v21 = vmul.f32 0.6931472, %v3251_v39  ;;  %v1469_v3 = vsel %vm4501_vm14, %v1466_v44, %v1463_v30  ;;  %v3253_v40 = vpop.eup %3252  ;;  %3027 = vrot.lane.b32.xlu0 %v3026_v51, %s3312_s28  ;;  %v2182_v16 = vadd.f32 %v4306_v7, %v1949_v55 }
 0x343   :  { %v4519_v63 = vadd.f32 %v1469_v3, %v1069_v9  ;;  %v3061_v53 = vpack.i.bf16 %v2171_v48, %v2170_v29  ;;  %v3255_v19 = vpop.eup %3254  ;;  %v2185_v61 = vadd.f32 %v4350_v22, %v1955_v45  ;;  %vm4527_vm15 = vcmp.lt.f32.partialorder %v1458_v35, 0.0004427343  ;;  %v4533_v29 = vpop.permute.xlu0 %2124 }
 0x344   :  { %v1483_v28 = vadd.f32 1.0, %v1482_v4  ;;  %v1470_v44 = vadd.f32 1.0, %v3253_v40  ;;  %v3257_v9 = vpop.eup %3256  ;;  %v2184_v0 = vadd.f32 %v4359_v60, %v1953_v21  ;;  %v1454_v24 = vmul.f32 0.6931472, %v3255_v19 }
 0x345   :  { %3268 = vlog2.f32 %v4519_v63  ;;  %3062 = vrot.lane.b32.xlu1 %v3061_v53, %s3312_s28  ;;  %v2183_v55 = vadd.f32 %v4290_v12, %v1951_v56  ;;  %v1959_v22 = vmul.f32 0.6931472, %v3257_v9  ;;  %v1485_v5 = vand.u32 2147483647, %v4495_v58  ;;  %v2095_v53 = vpop.permute.xlu1 %2094 }
 0x346   :  { %v3259_v7 = vpop.eup %3258  ;;  %3270 = vlog2.f32 %v1470_v44  ;;  %v2173_v35 = vadd.f32 %v2091_v13, %v1931_v23  ;;  %v1460_v51 = vsel %vm4527_vm15, %v1457_v2, %v1454_v24  ;;  %v1473_v60 = vmul.f32 -0.5, %v3253_v40 }
 0x347   :  { %v3261_v48 = vpop.eup %3260  ;;  %v1929_v45 = vmul.f32 0.6931472, %v3259_v7  ;;  %v3036_v30 = vpack.i.bf16 %v2183_v55, %v2182_v16  ;;  %v4540_v4 = vadd.f32 %v1460_v51, %v1068_v20  ;;  %v3046_v3 = vpack.i.bf16 %v2185_v61, %v2184_v0 }
 0x348   :  { %v1935_v39 = vmul.f32 0.6931472, %v3261_v48  ;;  %v1484_v12 = vmul.f32 %v4495_v58, %v1483_v28  ;;  %v2187_v13 = vadd.f32 %v4406_v34, %v1959_v22  ;;  %vm4545_vm1 = vcmp.lt.f32.partialorder %v1485_v5, 0.0004427343 }
 0x349   :  { %v2172_v56 = vadd.f32 %v2089_v11, %v1929_v45  ;;  %3037 = vrot.lane.b32.xlu0 %v3036_v30, %s3312_s28  ;;  %3272 = vlog2.f32 %v4540_v4  ;;  %v1071_v16 = vmax.f32 %v4391_v37, 0.0  ;;  %v1474_v36 = vadd.f32 1.0, %v1473_v60  ;;  %v2093_v11 = vpop.permute.xlu0 %2092 }
 0x34a   :  { %v3263_v21 = vpop.eup %3262  ;;  %v1476_v44 = vand.u32 2147483647, %v3253_v40  ;;  %v2175_v9 = vadd.f32 %v2095_v53, %v1935_v39  ;;  %v1070_v60 = vmax.f32 %v4423_v54, 0.0 }
 0x34b   :  { %v3265_v19 = vpop.eup %3264  ;;  %v1957_v23 = vmul.f32 0.6931472, %v3263_v21  ;;  %v3071_v58 = vpack.i.bf16 %v2173_v35, %v2172_v56  ;;  %v1475_v5 = vmul.f32 %v3253_v40, %v1474_v36  ;;  %v3283_v36 = vld [vmem:[%s4979_s7 + $0x48] sm:$0xff] }
 0x34c   :  { %v3267_v20 = vpop.eup %3266  ;;  %v1481_v61 = vmul.f32 0.6931472, %v3265_v19  ;;  %vm1477_vm2 = vcmp.lt.f32.partialorder %v1476_v44, 0.0004427343  ;;  %v3280_v19 = vld [vmem:[%s4979_s7 + $0x18] sm:$0xff]  ;;  %v3289_v44 = vld [vmem:[%s4979_s7 + $0x20] sm:$0xff] }
 0x34d   :  { %v2186_v28 = vadd.f32 %v4418_v38, %v1957_v23  ;;  %v1933_v0 = vmul.f32 0.6931472, %v3267_v20  ;;  %3072 = vrot.lane.b32.xlu1 %v3071_v58, %s3312_s28  ;;  %3047 = vrot.lane.b32.xlu0 %v3046_v3, %s3312_s28  ;;  %v3279_v3 = vld [vmem:[%s4979_s7 + $0x8] sm:$0xff]  ;;  %v3282_v20 = vld [vmem:[%s4979_s7 + $0x38] sm:$0xff] }
 0x34e   :  { %v1487_v34 = vsel %vm4545_vm1, %v1484_v12, %v1481_v61  ;;  %v3285_v58 = vld [vmem:[%s4979_s7] sm:$0xff] }
 0x34f   :  { %v3056_v24 = vpack.i.bf16 %v2187_v13, %v2186_v28  ;;  %v4556_v55 = vadd.f32 %v1487_v34, %v1071_v16  ;;  %v2174_v7 = vadd.f32 %v2093_v11, %v1933_v0  ;;  %v3269_v22 = vpop.eup %3268  ;;  %v3281_v13 = vld [vmem:[%s4979_s7 + $0x28] sm:$0xff]  ;;  %v3287_v11 = vld [vmem:[%s4979_s7 + $0x10] sm:$0xff]  ;;  %v3288_v28 = vld [vmem:[%s4979_s7 + $0x78] sm:$0xff] }
 0x350   :  { %v3271_v35 = vpop.eup %3270  ;;  %v1963_v51 = vmul.f32 0.6931472, %v3269_v22  ;;  %v3291_v0 = vld [vmem:[%s4979_s7 + $0x30] sm:$0xff]  ;;  %v3292_v34 = vld [vmem:[%s4979_s7 + $0x98] sm:$0xff] }
 0x351   :  { %3274 = vlog2.f32 %v4556_v55  ;;  %v3081_v38 = vpack.i.bf16 %v2175_v9, %v2174_v7  ;;  %v1472_v48 = vmul.f32 0.6931472, %v3271_v35  ;;  %3057 = vrot.lane.b32.xlu0 %v3056_v24, %s3312_s28  ;;  %v3290_v9 = vld [vmem:[%s4979_s7 + $0x88] sm:$0xff]  ;;  %v3293_v24 = vld [vmem:[%s4979_s7 + $0x40] sm:$0xff]  ;;  %v3295_v22 = vld [vmem:[%s4979_s7 + $0x50] sm:$0xff] }
 0x352   :  { %v2189_v21 = vadd.f32 %v4473_v6, %v1963_v51  ;;  %v3294_v7 = vld [vmem:[%s4979_s7 + $0xa8] sm:$0xff]  ;;  %v3296_v35 = vld [vmem:[%s4979_s7 + $0xb8] sm:$0xff] }
 0x353   :  { %3082 = vrot.lane.b32.xlu1 %v3081_v38, %s3312_s28  ;;  %v1478_v45 = vsel %vm1477_vm2, %v1475_v5, %v1472_v48  ;;  %v3273_v30 = vpop.eup %3272  ;;  %v2192_v5 = vlaneseq  ;;  %v3297_v38 = vld [vmem:[%s4979_s7 + $0x60] sm:$0xff] }
 0x354   :  { %v4562_v39 = vadd.f32 %v1478_v45, %v1070_v60  ;;  %v1961_v40 = vmul.f32 0.6931472, %v3273_v30  ;;  %v3298_v60 = vld [vmem:[%s4979_s7 + $0xc8] sm:$0xff]  ;;  %v3299_v45 = vld [vmem:[%s4979_s7 + $0x70] sm:$0xff] }
 0x355   :  { %v2195_v48 = vshrl.u32 %v2192_v5, 7  ;;  %v2193_v30 = vand.u32 127, %v2192_v5 }
 0x356   :  { %3276 = vlog2.f32 %v4562_v39  ;;  %v2188_v12 = vadd.f32 %v4483_v8, %v1961_v40  ;;  %v3300_v40 = vld [vmem:[%s4979_s7 + $0xd8] sm:$0xff] }
 0x357   :  { %1586 = vrot.lane.b32.xlu1 %v3279_v3, %s3311_s22  ;;  %v2196_v51 = vmul.u32 16, %v2195_v48  ;;  %v3301_v3 = vld [vmem:[%s4979_s7 + $0x80] sm:$0xff] }
 0x358   :  { %v3066_v56 = vpack.i.bf16 %v2189_v21, %v2188_v12  ;;  %v3313_v12 = vmov 0.0  }
 0x359   :  { %v2198_v21 = vadd.s32 16, %v2196_v51  ;;  %vm2197_vm3 = vcmp.ge.s32.totalorder %v2193_v30, %v2196_v51 }
 0x35a   :  { %3067 = vrot.lane.b32.xlu0 %v3066_v56, %s3312_s28 }
 0x35b   :  { %v3275_v53 = vpop.eup %3274  ;;  %1590 = vrot.lane.b32.xlu1 %v3280_v19, %s3311_s22  ;;  %vm2199_vm4 = vcmp.lt.s32.totalorder %v2193_v30, %v2198_v21  ;;  %v3303_v19 = vld [vmem:[%s4979_s7 + $0x90] sm:$0xff] }
 0x35c   :  { %v1967_v6 = vmul.f32 0.6931472, %v3275_v53  ;;  %vm2200_vm5 = vmand %vm2197_vm3, %vm2199_vm4  ;;  %v3302_v53 = vld [vmem:[%s4979_s7 + $0xe8] sm:$0xff] }
 0x35d   :  { %v4663_v56 = vsel %vm2200_vm5, 1.0, %v3313_v12 }
 0x35e   :  { %v2191_v8 = vadd.f32 %v4522_v50, %v1967_v6  ;;  %v3284_v50 = vld [vmem:[%s4979_s7 + $0x58] sm:$0xff]  ;;  %2713 = vmatprep.mubr.msk.f32.mxu0 %vm354_vm0, %v4663_v56 }
 0x35f   :  { %1594 = vrot.lane.b32.xlu1 %v3281_v13, %s3311_s22  ;;  %v3304_v6 = vld [vmem:[%s4979_s7 + $0xf8] sm:$0xff]  ;;  %v3305_v13 = vld [vmem:[%s4979_s7 + $0xa0] sm:$0xff] }
 0x360   :  { %v3277_v23 = vpop.eup %3276 }
 0x361   :  { %v1965_v2 = vmul.f32 0.6931472, %v3277_v23  ;;  %v3306_v23 = vld [vmem:[%s4979_s7 + $0xb0] sm:$0xff] }
 0x363   :  { %1598 = vrot.lane.b32.xlu1 %v3282_v20, %s3311_s22  ;;  %v2190_v16 = vadd.f32 %v4533_v29, %v1965_v2  ;;  %v3286_v29 = vld [vmem:[%s4979_s7 + $0x68] sm:$0xff]  ;;  %v3013_v2 = vpop.permute.xlu1 %3012  ;;  %v3308_v20 = vld [vmem:[%s4979_s7 + $0xd0] sm:$0xff] }
 0x365   :  { %v3076_v61 = vpack.i.bf16 %v2191_v8, %v2190_v16  ;;  %v3307_v8 = vld [vmem:[%s4979_s7 + $0xc0] sm:$0xff] }
 0x367   :  { %1602 = vrot.lane.b32.xlu1 %v3283_v36, %s3311_s22  ;;  %3077 = vrot.lane.b32.xlu0 %v3076_v61, %s3312_s28  ;;  %v3023_v16 = vpop.permute.xlu1 %3022  ;;  %v3309_v61 = vld [vmem:[%s4979_s7 + $0xe0] sm:$0xff] }
 0x368   :  { %v3025_v48 = vunpack.i.h.bf16 %v3023_v16  ;;  %v3024_v51 = vunpack.i.l.bf16 %v3023_v16 }
 0x36a   :  { %v2964_v21 = vpack.c.bf16 %v3025_v48, %v3024_v51 }
 0x36b   :  { %1606 = vrot.lane.b32.xlu1 %v3284_v50, %s3311_s22  ;;  %1584 = vrot.lane.b32.xlu0 %v3285_v58, %s3311_s22  ;;  %v3310_v50 = vld [vmem:[%s4979_s7 + $0xf0] sm:$0xff]  ;;  %v3015_v58 = vunpack.i.h.bf16 %v3013_v2 }
 0x36f   :  { %1610 = vrot.lane.b32.xlu1 %v3286_v29, %s3311_s22  ;;  %1588 = vrot.lane.b32.xlu0 %v3287_v11, %s3311_s22  ;;  %v3014_v29 = vunpack.i.l.bf16 %v3013_v2 }
 0x373   :  { %1614 = vrot.lane.b32.xlu1 %v3288_v28, %s3311_s22  ;;  %1592 = vrot.lane.b32.xlu0 %v3289_v44, %s3311_s22 }
 0x376   :  { %v3033_v36 = vpop.permute.xlu1 %3032 }
 0x377   :  { %1618 = vrot.lane.b32.xlu1 %v3290_v9, %s3311_s22  ;;  %1596 = vrot.lane.b32.xlu0 %v3291_v0, %s3311_s22 }
 0x37b   :  { %1622 = vrot.lane.b32.xlu1 %v3292_v34, %s3311_s22  ;;  %1600 = vrot.lane.b32.xlu0 %v3293_v24, %s3311_s22  ;;  %v2958_v24 = vpack.c.bf16 %v3015_v58, %v3014_v29 }
 0x37f   :  { %1626 = vrot.lane.b32.xlu1 %v3294_v7, %s3311_s22  ;;  %1604 = vrot.lane.b32.xlu0 %v3295_v22, %s3311_s22 }
 0x383   :  { %1630 = vrot.lane.b32.xlu1 %v3296_v35, %s3311_s22  ;;  %1608 = vrot.lane.b32.xlu0 %v3297_v38, %s3311_s22 }
 0x387   :  { %1634 = vrot.lane.b32.xlu1 %v3298_v60, %s3311_s22  ;;  %1612 = vrot.lane.b32.xlu0 %v3299_v45, %s3311_s22 }
 0x38b   :  { %1638 = vrot.lane.b32.xlu1 %v3300_v40, %s3311_s22  ;;  %1616 = vrot.lane.b32.xlu0 %v3301_v3, %s3311_s22 }
 0x38f   :  { %1642 = vrot.lane.b32.xlu1 %v3302_v53, %s3311_s22  ;;  %1620 = vrot.lane.b32.xlu0 %v3303_v19, %s3311_s22  ;;  %v3035_v53 = vunpack.i.h.bf16 %v3033_v36  ;;  %v3034_v19 = vunpack.i.l.bf16 %v3033_v36 }
 0x390   :  { %v3043_v11 = vpop.permute.xlu1 %3042 }
 0x393   :  { %1646 = vrot.lane.b32.xlu1 %v3304_v6, %s3311_s22  ;;  %1624 = vrot.lane.b32.xlu0 %v3305_v13, %s3311_s22 }
 0x397   :  { %1628 = vrot.lane.b32.xlu0 %v3306_v23, %s3311_s22 }
 0x39b   :  { %1632 = vrot.lane.b32.xlu0 %v3307_v8, %s3311_s22  ;;  %v2970_v8 = vpack.c.bf16 %v3035_v53, %v3034_v19 }
 0x39f   :  { %1636 = vrot.lane.b32.xlu0 %v3308_v20, %s3311_s22 }
 0x3a2   :  { %v3053_v35 = vpop.permute.xlu1 %3052 }
 0x3a3   :  { %1640 = vrot.lane.b32.xlu0 %v3309_v61, %s3311_s22  ;;  %v3045_v61 = vunpack.i.h.bf16 %v3043_v11 }
 0x3a7   :  { %1644 = vrot.lane.b32.xlu0 %v3310_v50, %s3311_s22  ;;  %v3044_v50 = vunpack.i.l.bf16 %v3043_v11  ;;  %v5142_v11 = vld [vmem:[#allocation18_spill] sm:$0xff] }
 0x3a9   :  { %v2976_v36 = vpack.c.bf16 %v3045_v61, %v3044_v50 }
 0x3ac   :  { %v3008_v28 = vpop.permute.xlu0 %3007 }
 0x3ad   :  { %v3010_v44 = vunpack.i.h.bf16 %v3008_v28  ;;  %v3009_v9 = vunpack.i.l.bf16 %v3008_v28 }
 0x3af   :  { %v2955_v34 = vpack.c.bf16 %v3010_v44, %v3009_v9  ;;  %v5141_v44 = vld [vmem:[#allocation13_spill] sm:$0xff] }
 0x3b0   :  { %v3018_v7 = vpop.permute.xlu0 %3017 }
 0x3b1   :  { %v3020_v22 = vunpack.i.h.bf16 %v3018_v7  ;;  %v3019_v5 = vunpack.i.l.bf16 %v3018_v7  ;;  %2957 = vmatprep.subr.msk.bf16.mxu0 %vm4705_vm6, %v2955_v34 }
 0x3b2   :  { %2960 = vmatpush3.bf16.xpose.msk.msra.mxu0 %vm4705_vm6, %v2958_v24 }
 0x3b3   :  { %v2961_v38 = vpack.c.bf16 %v3020_v22, %v3019_v5  ;;  %v3055_v22 = vunpack.i.h.bf16 %v3053_v35  ;;  %v3054_v5 = vunpack.i.l.bf16 %v3053_v35 }
 0x3b4   :  { %v3028_v60 = vpop.permute.xlu0 %3027 }
 0x3b5   :  { %v3030_v45 = vunpack.i.h.bf16 %v3028_v60  ;;  %v3029_v30 = vunpack.i.l.bf16 %v3028_v60  ;;  %2963 = vmatprep.subr.msk.bf16.mxu0 %vm4705_vm6, %v2961_v38 }
 0x3b7   :  { %v3063_v40 = vpop.permute.xlu1 %3062  ;;  %v2967_v3 = vpack.c.bf16 %v3030_v45, %v3029_v30  ;;  %v2982_v45 = vpack.c.bf16 %v3055_v22, %v3054_v5  ;;  %v5143_v30 = vld [vmem:[#allocation22_spill] sm:$0xff] }
 0x3b8   :  { %v3065_v35 = vunpack.i.h.bf16 %v3063_v40  ;;  %v3064_v19 = vunpack.i.l.bf16 %v3063_v40 }
 0x3ba   :  { %2966 = vmatpush3.bf16.xpose.msk.msra.mxu0 %vm4705_vm6, %v2964_v21 }
 0x3bb   :  { %v3038_v12 = vpop.permute.xlu0 %3037  ;;  %2969 = vmatprep.subr.msk.bf16.mxu0 %vm4705_vm6, %v2967_v3 }
 0x3bc   :  { %v3040_v6 = vunpack.i.h.bf16 %v3038_v12  ;;  %v3039_v13 = vunpack.i.l.bf16 %v3038_v12 }
 0x3be   :  { %v2973_v2 = vpack.c.bf16 %v3040_v6, %v3039_v13 }
 0x3bf   :  { %v3073_v23 = vpop.permute.xlu1 %3072  ;;  %v3048_v20 = vpop.permute.xlu0 %3047 }
 0x3c0   :  { %v3050_v58 = vunpack.i.h.bf16 %v3048_v20  ;;  %v3049_v29 = vunpack.i.l.bf16 %v3048_v20  ;;  %v2988_v20 = vpack.c.bf16 %v3065_v35, %v3064_v19  ;;  %v3074_v40 = vunpack.i.l.bf16 %v3073_v23 }
 0x3c2   :  { %2972 = vmatpush3.bf16.xpose.msk.msra.mxu0 %vm4705_vm6, %v2970_v8  ;;  %v2979_v34 = vpack.c.bf16 %v3050_v58, %v3049_v29 }
 0x3c3   :  { %2975 = vmatprep.subr.msk.bf16.mxu0 %vm4705_vm6, %v2973_v2  ;;  %v3058_v24 = vpop.permute.xlu0 %3057 }
 0x3c4   :  { %v3060_v48 = vunpack.i.h.bf16 %v3058_v24  ;;  %v3059_v51 = vunpack.i.l.bf16 %v3058_v24 }
 0x3c5   :  { %v4721_v16 = vpop.permute.xlu1 %3082 }
 0x3c6   :  { %v2985_v3 = vpack.c.bf16 %v3060_v48, %v3059_v51  ;;  %v3084_v51 = vunpack.i.l.bf16 %v4721_v16 }
 0x3c9   :  { %v1587_v28 = vpop.permute.xlu1 %1586 }
 0x3ca   :  { %v1681_v9 = vmul.f32 %v1587_v28, %v5141_v44  ;;  %2978 = vmatpush3.bf16.xpose.msk.msra.mxu0 %vm4705_vm6, %v2976_v36 }
 0x3cb   :  { %2981 = vmatprep.subr.msk.bf16.mxu0 %vm4705_vm6, %v2979_v34  ;;  %v5144_v34 = vld [vmem:[#allocation14_spill] sm:$0xff] }
 0x3cc   :  { %1746 = vrot.lane.b32.xlu1 %v1681_v9, %s3312_s28  ;;  %v3068_v12 = vpop.permute.xlu0 %3067 }
 0x3cd   :  { %v1591_v7 = vpop.permute.xlu1 %1590  ;;  %v3070_v13 = vunpack.i.h.bf16 %v3068_v12  ;;  %v3069_v8 = vunpack.i.l.bf16 %v3068_v12 }
 0x3ce   :  { %v1683_v38 = vmul.f32 %v1591_v7, %v5142_v11 }
 0x3cf   :  { %v2991_v58 = vpack.c.bf16 %v3070_v13, %v3069_v8  ;;  %v5148_v13 = vld [vmem:[#allocation27_spill] sm:$0xff] }
 0x3d0   :  { %1750 = vrot.lane.b32.xlu1 %v1683_v38, %s3312_s28  ;;  %v5145_v38 = vld [vmem:[#allocation19_spill] sm:$0xff] }
 0x3d1   :  { %v1595_v60 = vpop.permute.xlu1 %1594 }
 0x3d2   :  { %v1685_v21 = vmul.f32 %v1595_v60, %v5143_v30  ;;  %2984 = vmatpush3.bf16.xpose.msk.msra.mxu0 %vm4705_vm6, %v2982_v45  ;;  %v5146_v45 = vld [vmem:[#allocation23_spill] sm:$0xff] }
 0x3d3   :  { %2987 = vmatprep.subr.msk.bf16.mxu0 %vm4705_vm6, %v2985_v3 }
 0x3d4   :  { %1754 = vrot.lane.b32.xlu1 %v1685_v21, %s3312_s28 }
 0x3d5   :  { %v1599_v53 = vpop.permute.xlu1 %1598 }
 0x3d6   :  { %v1687_v6 = vmul.f32 %v1599_v53, %v4066_v27  ;;  %v3075_v27 = vunpack.i.h.bf16 %v3073_v23  ;;  %v3085_v23 = vunpack.i.h.bf16 %v4721_v16  ;;  %v5147_v16 = vld [vmem:[#allocation36_spill] sm:$0xff] }
 0x3d8   :  { %1758 = vrot.lane.b32.xlu1 %v1687_v6, %s3312_s28  ;;  %v2994_v7 = vpack.c.bf16 %v3075_v27, %v3074_v40  ;;  %v3000_v3 = vpack.c.bf16 %v3085_v23, %v3084_v51  ;;  %v5151_v23 = vld [vmem:[#allocation2_spill] sm:$0xff]  ;;  %v5152_v51 = vld [vmem:[#allocation4_spill] sm:$0xff] }
 0x3d9   :  { %v1603_v2 = vpop.permute.xlu1 %1602  ;;  %v3078_v50 = vpop.permute.xlu0 %3077 }
 0x3da   :  { %v1689_v61 = vmul.f32 %v1603_v2, %v4119_v62  ;;  %2990 = vmatpush3.bf16.xpose.msk.msra.mxu0 %vm4705_vm6, %v2988_v20  ;;  %v3080_v44 = vunpack.i.h.bf16 %v3078_v50  ;;  %v3079_v9 = vunpack.i.l.bf16 %v3078_v50 }
 0x3db   :  { %2993 = vmatprep.subr.msk.bf16.mxu0 %vm4705_vm6, %v2991_v58 }
 0x3dc   :  { %1762 = vrot.lane.b32.xlu1 %v1689_v61, %s3312_s28  ;;  %v2997_v11 = vpack.c.bf16 %v3080_v44, %v3079_v9  ;;  %v5150_v9 = vld [vmem:[#allocation37_spill] sm:$0xff] }
 0x3dd   :  { %v1607_v29 = vpop.permute.xlu1 %1606  ;;  %v1585_v36 = vpop.permute.xlu0 %1584 }
 0x3de   :  { %v1691_v28 = vmul.f32 %v1607_v29, %v4157_v52  ;;  %v1680_v62 = vmul.f32 %v1585_v36, %v5144_v34 }
 0x3e0   :  { %1766 = vrot.lane.b32.xlu1 %v1691_v28, %s3312_s28  ;;  %1744 = vrot.lane.b32.xlu0 %v1680_v62, %s3312_s28  ;;  %v5149_v28 = vld [vmem:[#allocation34_spill] sm:$0xff] }
 0x3e1   :  { %v1611_v24 = vpop.permute.xlu1 %1610  ;;  %v1589_v5 = vpop.permute.xlu0 %1588 }
 0x3e2   :  { %v1693_v22 = vmul.f32 %v1611_v24, %v4201_v14  ;;  %v1682_v48 = vmul.f32 %v1589_v5, %v5145_v38  ;;  %2996 = vmatpush3.bf16.xpose.msk.msra.mxu0 %vm4705_vm6, %v2994_v7 }
 0x3e3   :  { %2999 = vmatprep.subr.msk.bf16.mxu0 %vm4705_vm6, %v2997_v11 }
 0x3e4   :  { %1770 = vrot.lane.b32.xlu1 %v1693_v22, %s3312_s28  ;;  %1748 = vrot.lane.b32.xlu0 %v1682_v48, %s3312_s28 }
 0x3e5   :  { %v1615_v52 = vpop.permute.xlu1 %1614  ;;  %v1593_v60 = vpop.permute.xlu0 %1592 }
 0x3e6   :  { %v1695_v14 = vmul.f32 %v1615_v52, %v4268_v42  ;;  %v1684_v30 = vmul.f32 %v1593_v60, %v5146_v45 }
 0x3e8   :  { %1774 = vrot.lane.b32.xlu1 %v1695_v14, %s3312_s28  ;;  %1752 = vrot.lane.b32.xlu0 %v1684_v30, %s3312_s28  ;;  %v5154_v30 = vld [vmem:[#allocation8_spill] sm:$0xff] }
 0x3e9   :  { %v1619_v21 = vpop.permute.xlu1 %1618  ;;  %v1597_v53 = vpop.permute.xlu0 %1596 }
 0x3ea   :  { %v1697_v12 = vmul.f32 %v1619_v21, %v4238_v31  ;;  %v1686_v35 = vmul.f32 %v1597_v53, %v4113_v17  ;;  %3002 = vmatpush3.bf16.xpose.msk.msra.mxu0 %vm4705_vm6, %v3000_v3 }
 0x3ec   :  { %1778 = vrot.lane.b32.xlu1 %v1697_v12, %s3312_s28  ;;  %1756 = vrot.lane.b32.xlu0 %v1686_v35, %s3312_s28  ;;  %v5155_v12 = vld [vmem:[#allocation10_spill] sm:$0xff] }
 0x3ed   :  { %v1623_v42 = vpop.permute.xlu1 %1622  ;;  %v1601_v6 = vpop.permute.xlu0 %1600 }
 0x3ee   :  { %v1699_v19 = vmul.f32 %v1623_v42, %v5147_v16  ;;  %v1688_v8 = vmul.f32 %v1601_v6, %v5148_v13  ;;  %v5156_v42 = vld [vmem:[#allocation12_spill] sm:$0xff]  ;;  %v5157_v6 = vld [vmem:[#allocation3_spill] sm:$0xff] }
 0x3f0   :  { %1782 = vrot.lane.b32.xlu1 %v1699_v19, %s3312_s28  ;;  %1760 = vrot.lane.b32.xlu0 %v1688_v8, %s3312_s28 }
 0x3f1   :  { %v1627_v2 = vpop.permute.xlu1 %1626  ;;  %v1605_v31 = vpop.permute.xlu0 %1604  ;;  %2714 = vmatmul.mubr.msk.f32.vlgmr.msra.gmra.mrb[32].mxu0 %vm354_vm0, %v4663_v56 }
 0x3f2   :  { %v1701_v17 = vmul.f32 %v1627_v2, %v4356_v43  ;;  %v1690_v20 = vmul.f32 %v1605_v31, %v4182_v18  ;;  %v5158_v2 = vld [vmem:[#allocation16_spill] sm:$0xff] }
 0x3f4   :  { %1786 = vrot.lane.b32.xlu1 %v1701_v17, %s3312_s28  ;;  %1764 = vrot.lane.b32.xlu0 %v1690_v20, %s3312_s28  ;;  %v5159_v20 = vld [vmem:[#allocation5_spill] sm:$0xff] }
 0x3f5   :  { %v1631_v0 = vpop.permute.xlu1 %1630  ;;  %v1609_v50 = vpop.permute.xlu0 %1608 }
 0x3f6   :  { %v1703_v61 = vmul.f32 %v1631_v0, %v4399_v1  ;;  %v1692_v58 = vmul.f32 %v1609_v50, %v4224_v41  ;;  %v5160_v50 = vld [vmem:[#allocation20_spill] sm:$0xff] }
 0x3f8   :  { %1790 = vrot.lane.b32.xlu1 %v1703_v61, %s3312_s28  ;;  %1768 = vrot.lane.b32.xlu0 %v1692_v58, %s3312_s28 }
 0x3f9   :  { %v1635_v29 = vpop.permute.xlu1 %1634  ;;  %v1613_v43 = vpop.permute.xlu0 %1612 }
 0x3fa   :  { %v1705_v18 = vmul.f32 %v1635_v29, %v4433_v49  ;;  %v1694_v56 = vmul.f32 %v1613_v43, %v4272_v26 }
 0x3fc   :  { %1794 = vrot.lane.b32.xlu1 %v1705_v18, %s3312_s28  ;;  %1772 = vrot.lane.b32.xlu0 %v1694_v56, %s3312_s28  ;;  %v5161_v18 = vld [vmem:[#allocation7_spill] sm:$0xff] }
 0x3fd   :  { %v1639_v27 = vpop.permute.xlu1 %1638  ;;  %v1617_v40 = vpop.permute.xlu0 %1616 }
 0x3fe   :  { %v1707_v1 = vmul.f32 %v1639_v27, %v4478_v15  ;;  %v1696_v41 = vmul.f32 %v1617_v40, %v5149_v28  ;;  %v5162_v27 = vld [vmem:[#allocation24_spill] sm:$0xff]  ;;  %v5163_v28 = vld [vmem:[#allocation9_spill] sm:$0xff] }
 0x400   :  { %1798 = vrot.lane.b32.xlu1 %v1707_v1, %s3312_s28  ;;  %1776 = vrot.lane.b32.xlu0 %v1696_v41, %s3312_s28 }
 0x401   :  { %v1643_v36 = vpop.permute.xlu1 %1642  ;;  %v1621_v44 = vpop.permute.xlu0 %1620 }
 0x402   :  { %v1709_v49 = vmul.f32 %v1643_v36, %v4519_v63  ;;  %v1698_v26 = vmul.f32 %v1621_v44, %v5150_v9 }
 0x404   :  { %1802 = vrot.lane.b32.xlu1 %v1709_v49, %s3312_s28  ;;  %1780 = vrot.lane.b32.xlu0 %v1698_v26, %s3312_s28  ;;  %v5164_v49 = vld [vmem:[#allocation26_spill] sm:$0xff]  ;;  %v5165_v26 = vld [vmem:[#allocation11_spill] sm:$0xff] }
 0x405   :  { %v1647_v34 = vpop.permute.xlu1 %1646  ;;  %v1625_v62 = vpop.permute.xlu0 %1624 }
 0x406   :  { %v1711_v15 = vmul.f32 %v1647_v34, %v4556_v55  ;;  %v1700_v24 = vmul.f32 %v1625_v62, %v4385_v47  ;;  %v5166_v62 = vld [vmem:[#allocation29_spill] sm:$0xff] }
 0x408   :  { %1806 = vrot.lane.b32.xlu1 %v1711_v15, %s3312_s28  ;;  %1784 = vrot.lane.b32.xlu0 %v1700_v24, %s3312_s28 }
 0x409   :  { %v1629_v7 = vpop.permute.xlu0 %1628 }
 0x40a   :  { %v1702_v63 = vmul.f32 %v1629_v7, %v4411_v59 }
 0x40c   :  { %1788 = vrot.lane.b32.xlu0 %v1702_v63, %s3312_s28  ;;  %v5167_v63 = vld [vmem:[#allocation15_spill] sm:$0xff] }
 0x40d   :  { %v1633_v22 = vpop.permute.xlu0 %1632 }
 0x40e   :  { %v1704_v5 = vmul.f32 %v1633_v22, %v4458_v25 }
 0x410   :  { %1792 = vrot.lane.b32.xlu0 %v1704_v5, %s3312_s28 }
 0x411   :  { %v1637_v11 = vpop.permute.xlu0 %1636 }
 0x412   :  { %v1706_v55 = vmul.f32 %v1637_v11, %v4499_v10 }
 0x414   :  { %1796 = vrot.lane.b32.xlu0 %v1706_v55, %s3312_s28 }
 0x415   :  { %v1641_v47 = vpop.permute.xlu0 %1640 }
 0x416   :  { %v1708_v38 = vmul.f32 %v1641_v47, %v4540_v4  ;;  %v5168_v47 = vld [vmem:[#allocation17_spill] sm:$0xff] }
 0x418   :  { %1800 = vrot.lane.b32.xlu0 %v1708_v38, %s3312_s28 }
 0x419   :  { %v1645_v48 = vpop.permute.xlu0 %1644 }
 0x41a   :  { %v1710_v59 = vmul.f32 %v1645_v48, %v4562_v39  ;;  %v5153_v39 = vld [vmem:[#allocation6_spill] sm:$0xff] }
 0x41c   :  { %1804 = vrot.lane.b32.xlu0 %v1710_v59, %s3312_s28  ;;  %v5169_v59 = vld [vmem:[#allocation32_spill] sm:$0xff] }
 0x43e   :  { %v1747_v52 = vpop.permute.xlu1 %1746 }
 0x43f   :  { %v1841_v25 = vadd.f32 %v1747_v52, %v5151_v23 }
 0x441   :  { %1873 = vst.msk [vmem:[%s4982_s8 + $0x8] sm:$0xff] %vm354_vm0, %v1841_v25  ;;  %v5170_v25 = vld [vmem:[#allocation21_spill] sm:$0xff] }
 0x442   :  { %v1751_v10 = vpop.permute.xlu1 %1750 }
 0x443   :  { %v1843_v14 = vadd.f32 %v1751_v10, %v5152_v51 }
 0x445   :  { %1875 = vst.msk [vmem:[%s4982_s8 + $0x18] sm:$0xff] %vm354_vm0, %v1843_v14 }
 0x446   :  { %v1755_v4 = vpop.permute.xlu1 %1754 }
 0x447   :  { %v1845_v60 = vadd.f32 %v1755_v4, %v5153_v39  ;;  %v5171_v4 = vld [vmem:[#allocation25_spill] sm:$0xff] }
 0x449   :  { %1877 = vst.msk [vmem:[%s4982_s8 + $0x28] sm:$0xff] %vm354_vm0, %v1845_v60 }
 0x44a   :  { %v1759_v45 = vpop.permute.xlu1 %1758 }
 0x44b   :  { %v1847_v21 = vadd.f32 %v1759_v45, %v5154_v30 }
 0x44d   :  { %1879 = vst.msk [vmem:[%s4982_s8 + $0x38] sm:$0xff] %vm354_vm0, %v1847_v21  ;;  %v5172_v21 = vld [vmem:[#allocation28_spill] sm:$0xff] }
 0x44e   :  { %v1763_v3 = vpop.permute.xlu1 %1762 }
 0x44f   :  { %v1849_v53 = vadd.f32 %v1763_v3, %v5155_v12 }
 0x451   :  { %1881 = vst.msk [vmem:[%s4982_s8 + $0x48] sm:$0xff] %vm354_vm0, %v1849_v53 }
 0x452   :  { %v1767_v35 = vpop.permute.xlu1 %1766  ;;  %v1745_v19 = vpop.permute.xlu0 %1744 }
 0x453   :  { %v1851_v16 = vadd.f32 %v1767_v35, %v5156_v42  ;;  %v1840_v13 = vadd.f32 %v1745_v19, %v5157_v6  ;;  %v5173_v35 = vld [vmem:[#allocation30_spill] sm:$0xff]  ;;  %v5175_v6 = vld [vmem:[#allocation33_spill] sm:$0xff] }
 0x455   :  { %1883 = vst.msk [vmem:[%s4982_s8 + $0x58] sm:$0xff] %vm354_vm0, %v1851_v16  ;;  %1872 = vst.msk [vmem:[%s4982_s8] sm:$0xff] %vm354_vm0, %v1840_v13  ;;  %v5174_v16 = vld [vmem:[#allocation31_spill] sm:$0xff] }
 0x456   :  { %v1771_v8 = vpop.permute.xlu1 %1770  ;;  %v1749_v31 = vpop.permute.xlu0 %1748 }
 0x457   :  { %v1853_v17 = vadd.f32 %v1771_v8, %v5158_v2  ;;  %v1842_v0 = vadd.f32 %v1749_v31, %v5159_v20  ;;  %v5176_v2 = vld [vmem:[#allocation35_spill] sm:$0xff] }
 0x459   :  { %1885 = vst.msk [vmem:[%s4982_s8 + $0x68] sm:$0xff] %vm354_vm0, %v1853_v17  ;;  %1874 = vst.msk [vmem:[%s4982_s8 + $0x10] sm:$0xff] %vm354_vm0, %v1842_v0 }
 0x45a   :  { %v1775_v61 = vpop.permute.xlu1 %1774  ;;  %v1753_v29 = vpop.permute.xlu0 %1752 }
 0x45b   :  { %v1855_v58 = vadd.f32 %v1775_v61, %v5160_v50  ;;  %v1844_v43 = vadd.f32 %v1753_v29, %v5161_v18 }
 0x45d   :  { %1887 = vst.msk [vmem:[%s4982_s8 + $0x78] sm:$0xff] %vm354_vm0, %v1855_v58  ;;  %1876 = vst.msk [vmem:[%s4982_s8 + $0x20] sm:$0xff] %vm354_vm0, %v1844_v43 }
 0x45e   :  { %v1779_v56 = vpop.permute.xlu1 %1778  ;;  %v1757_v40 = vpop.permute.xlu0 %1756 }
 0x45f   :  { %v1857_v1 = vadd.f32 %v1779_v56, %v5162_v27  ;;  %v1846_v41 = vadd.f32 %v1757_v40, %v5163_v28 }
 0x461   :  { %1889 = vst.msk [vmem:[%s4982_s8 + $0x88] sm:$0xff] %vm354_vm0, %v1857_v1  ;;  %1878 = vst.msk [vmem:[%s4982_s8 + $0x30] sm:$0xff] %vm354_vm0, %v1846_v41 }
 0x462   :  { %v1783_v36 = vpop.permute.xlu1 %1782  ;;  %v1761_v9 = vpop.permute.xlu0 %1760 }
 0x463   :  { %v1859_v44 = vadd.f32 %v1783_v36, %v5164_v49  ;;  %v1848_v34 = vadd.f32 %v1761_v9, %v5165_v26 }
 0x465   :  { %1891 = vst.msk [vmem:[%s4982_s8 + $0x98] sm:$0xff] %vm354_vm0, %v1859_v44  ;;  %1880 = vst.msk [vmem:[%s4982_s8 + $0x40] sm:$0xff] %vm354_vm0, %v1848_v34 }
 0x466   :  { %v1787_v15 = vpop.permute.xlu1 %1786  ;;  %v1765_v7 = vpop.permute.xlu0 %1764 }
 0x467   :  { %v1861_v24 = vadd.f32 %v1787_v15, %v5166_v62  ;;  %v1850_v22 = vadd.f32 %v1765_v7, %v5167_v63 }
 0x469   :  { %1893 = vst.msk [vmem:[%s4982_s8 + $0xa8] sm:$0xff] %vm354_vm0, %v1861_v24  ;;  %1882 = vst.msk [vmem:[%s4982_s8 + $0x50] sm:$0xff] %vm354_vm0, %v1850_v22 }
 0x46a   :  { %v1791_v5 = vpop.permute.xlu1 %1790  ;;  %v1769_v55 = vpop.permute.xlu0 %1768 }
 0x46b   :  { %v1863_v11 = vadd.f32 %v1791_v5, %v4197_v32  ;;  %v1852_v38 = vadd.f32 %v1769_v55, %v5168_v47 }
 0x46d   :  { %1895 = vst.msk [vmem:[%s4982_s8 + $0xb8] sm:$0xff] %vm354_vm0, %v1863_v11  ;;  %1884 = vst.msk [vmem:[%s4982_s8 + $0x60] sm:$0xff] %vm354_vm0, %v1852_v38 }
 0x46e   :  { %v1795_v48 = vpop.permute.xlu1 %1794  ;;  %v1773_v23 = vpop.permute.xlu0 %1772 }
 0x46f   :  { %v1865_v52 = vadd.f32 %v1795_v48, %v5169_v59  ;;  %v1854_v10 = vadd.f32 %v1773_v23, %v5170_v25 }
 0x471   :  { %1897 = vst.msk [vmem:[%s4982_s8 + $0xc8] sm:$0xff] %vm354_vm0, %v1865_v52  ;;  %1886 = vst.msk [vmem:[%s4982_s8 + $0x70] sm:$0xff] %vm354_vm0, %v1854_v10 }
 0x472   :  { %v1799_v32 = vpop.permute.xlu1 %1798  ;;  %v1777_v14 = vpop.permute.xlu0 %1776 }
 0x473   :  { %v1867_v51 = vadd.f32 %v1799_v32, %v4264_v46  ;;  %v1856_v39 = vadd.f32 %v1777_v14, %v5171_v4 }
 0x475   :  { %1899 = vst.msk [vmem:[%s4982_s8 + $0xd8] sm:$0xff] %vm354_vm0, %v1867_v51  ;;  %1888 = vst.msk [vmem:[%s4982_s8 + $0x80] sm:$0xff] %vm354_vm0, %v1856_v39 }
 0x476   :  { %v1803_v60 = vpop.permute.xlu1 %1802  ;;  %v1781_v30 = vpop.permute.xlu0 %1780 }
 0x477   :  { %v1869_v45 = vadd.f32 %v1803_v60, %v4348_v57  ;;  %v1858_v3 = vadd.f32 %v1781_v30, %v5172_v21 }
 0x479   :  { %1901 = vst.msk [vmem:[%s4982_s8 + $0xe8] sm:$0xff] %vm354_vm0, %v1869_v45  ;;  %1890 = vst.msk [vmem:[%s4982_s8 + $0x90] sm:$0xff] %vm354_vm0, %v1858_v3 }
 0x47a   :  { %v1807_v46 = vpop.permute.xlu1 %1806  ;;  %v1785_v53 = vpop.permute.xlu0 %1784 }
 0x47b   :  { %v1871_v12 = vadd.f32 %v1807_v46, %v4391_v37  ;;  %v1860_v42 = vadd.f32 %v1785_v53, %v5173_v35 }
 0x47d   :  { %1903 = vst.msk [vmem:[%s4982_s8 + $0xf8] sm:$0xff] %vm354_vm0, %v1871_v12  ;;  %1892 = vst.msk [vmem:[%s4982_s8 + $0xa0] sm:$0xff] %vm354_vm0, %v1860_v42 }
 0x47e   :  { %v1789_v57 = vpop.permute.xlu0 %1788 }
 0x47f   :  { %v1862_v19 = vadd.f32 %v1789_v57, %v5174_v16 }
 0x481   :  { %1894 = vst.msk [vmem:[%s4982_s8 + $0xb0] sm:$0xff] %vm354_vm0, %v1862_v19 }
 0x482   :  { %v1793_v37 = vpop.permute.xlu0 %1792 }
 0x483   :  { %v1864_v13 = vadd.f32 %v1793_v37, %v5175_v6 }
 0x485   :  { %1896 = vst.msk [vmem:[%s4982_s8 + $0xc0] sm:$0xff] %vm354_vm0, %v1864_v13 }
 0x486   :  { %v1797_v8 = vpop.permute.xlu0 %1796 }
 0x487   :  { %v1866_v17 = vadd.f32 %v1797_v8, %v5176_v2 }
 0x489   :  { %1898 = vst.msk [vmem:[%s4982_s8 + $0xd0] sm:$0xff] %vm354_vm0, %v1866_v17 }
 0x48a   :  { %v1801_v31 = vpop.permute.xlu0 %1800 }
 0x48b   :  { %v1868_v20 = vadd.f32 %v1801_v31, %v4377_v33 }
 0x48d   :  { %1900 = vst.msk [vmem:[%s4982_s8 + $0xe0] sm:$0xff] %vm354_vm0, %v1868_v20 }
 0x48e   :  { %v1805_v0 = vpop.permute.xlu0 %1804 }
 0x48f   :  { %v1870_v61 = vadd.f32 %v1805_v0, %v4423_v54 }
 0x491   :  { %1902 = vst.msk [vmem:[%s4982_s8 + $0xf0] sm:$0xff] %vm354_vm0, %v1870_v61 }
 0x4c4   :  { %v2432_v50 = vpop.f32.mrb[32].mxu0 }
 0x4c5   :  { %v2437_v58 = vsub.f32 -14.703016, %v2432_v50  ;;  %v2434_v29 = vpop.f32.mrb[33].mxu0 }
 0x4c6   :  { %v2438_v18 = vsub.f32 -14.703016, %v2434_v29 }
 0x4c8   :  { %v2441_v43 = vcombine.low %v2437_v58, %v2438_v18 }
 0x4ca   :  { %2560 = vst.sshfl [vmem:[%s4983_s9] sm:$0x33 pattern:$0x76325410] %v2441_v43 }

</bundles_post_ra>
